<compile_context>
chip_gen: v7x
topology: tpu7x:2x2x1
jax: 0.10.0
libtpu: 0.0.40
codegen_flags: <defaults>
</compile_context>

<pallas_src>
import functools

import jax
import jax.numpy as jnp
from jax import lax
from jax.experimental import pallas as pl
from jax.experimental.pallas import tpu as pltpu


def _round_up(x, m):
    return ((x + m - 1) // m) * m


def _cdiv(a, b):
    return -(-a // b)


def attn_net_kernel(x_ref, w1_ref, b1_ref, w2_ref, b2_ref, a_ref, *, lane_dense_out):
    # First layer on the MXU: bf16 x bf16 -> f32 accumulation.  w1 is pre-cast to bf16
    # in the wrapper; if x is already bf16 the astype below is a no-op.
    h = jnp.dot(
        x_ref[...].astype(jnp.bfloat16),
        w1_ref[...],
        preferred_element_type=jnp.float32,
    )
    # Bias + tanh in f32 (EUP slot, hidden under the MXU/DMA; f32 keeps v5e happy).
    h = jnp.tanh(h + b1_ref[...])

    if lane_dense_out:
        # n_classes == 1: w2_ref is a lane-dense (1, D) row.  Contract D against the
        # last dim of h (q·kᵀ-style dot_general) so the result is a lane-dense
        # (1, block_m) row -> unmasked stores + contiguous output DMA.
        a = lax.dot_general(
            w2_ref[...],
            h.astype(jnp.bfloat16),
            dimension_numbers=(((1,), (1,)), ((), ())),
            preferred_element_type=jnp.float32,
        )
    else:
        # General n_classes: small second MXU matmul, bf16 in / f32 accumulate.
        a = jnp.dot(
            h.astype(jnp.bfloat16),
            w2_ref[...],
            preferred_element_type=jnp.float32,
        )

    # TODO(synk): if a downstream softmax/top-k over A follows (CLAM pooling), fuse it
    # here so the logits never round-trip to HBM.  (Fusing would also require the fused
    # op to ignore the garbage tail rows of a partial last block.)
    a_ref[...] = (a + b2_ref[...]).astype(a_ref.dtype)


def attn_net_forward(x, w1, b1, w2, b2, *, block_m=1024):
    """Pallas equivalent of Attn_Net.forward. Returns (A, x).

    Pass x in bf16 end-to-end if the producer can emit bf16 activations: the kernel's
    in-kernel cast becomes a no-op and the dominant HBM read stream is halved (A then
    comes back in bf16 as well).
    """
    n, l = x.shape
    d = w1.shape[-1]
    c = w2.shape[-1]

    # Hoisted one-time weight casts (no per-grid-step astype inside the kernel).
    w1_b = jnp.asarray(w1).astype(jnp.bfloat16)
    b1_f = jnp.asarray(b1, jnp.float32).reshape(1, d)
    b2_f = jnp.asarray(b2, jnp.float32).reshape(1, c)
    lane_dense_out = c == 1
    w2_b = (jnp.asarray(w2).reshape(1, d) if lane_dense_out else jnp.asarray(w2)).astype(
        jnp.bfloat16
    )

    # Token-axis tile.  128-row granularity keeps the lane-dense C==1 output aligned;
    # target >=4 grid steps (>=2 per v7x TensorCore) but never drop below 256 rows
    # (~63% of HBM roofline).  Caller-requested block_m is an upper bound; keep it
    # <= ~2048 with f32 x so double-buffered tiles fit v7x's 64 MiB/TC VMEM.
    _MIN_BLOCK_M = 256
    _TARGET_GRID_STEPS = 4
    block_m = max(_MIN_BLOCK_M, _round_up(int(block_m), 128))
    block_m = min(block_m, max(_MIN_BLOCK_M, _round_up(_cdiv(n, _TARGET_GRID_STEPS), 128)))
    n_blocks = _cdiv(n, block_m)
    grid = (n_blocks,)

    out_dtype = x.dtype
    x_itemsize = jnp.dtype(x.dtype).itemsize
    out_itemsize = jnp.dtype(out_dtype).itemsize

    if lane_dense_out:
        # Lane-dense output: one row of length n_blocks*block_m, one (1, block_m) tile
        # per grid step; columns >= n (garbage from the partial last block) are sliced
        # off below and never read.
        out_shape = jax.ShapeDtypeStruct((1, n_blocks * block_m), out_dtype)
        out_spec = pl.BlockSpec((1, block_m), lambda i: (0, i))
    else:
        out_shape = jax.ShapeDtypeStruct((n, c), out_dtype)
        out_spec = pl.BlockSpec((block_m, c), lambda i: (i, 0))

    in_specs = [
        pl.BlockSpec((block_m, l), lambda i: (i, 0)),   # x: streamed tiles (ragged last block OK)
        pl.BlockSpec((l, d), lambda i: (0, 0)),         # w1 (bf16): VMEM-resident
        pl.BlockSpec((1, d), lambda i: (0, 0)),         # b1 (f32): VMEM-resident
        pl.BlockSpec(w2_b.shape, lambda i: (0, 0)),     # w2 row / matrix (bf16): resident
        pl.BlockSpec((1, c), lambda i: (0, 0)),         # b2 (f32): VMEM-resident
    ]

    # Scoped-VMEM budget: double-buffered x/out tiles + resident bf16 weights + f32
    # hidden activations (+ bf16 / transposed staging) + headroom.  Explicit so v5e's
    # 16 MiB default doesn't throttle double buffering; capped at 48 MiB so the budget
    # stays inside v7x's 64 MiB physical VMEM (do not raise this cap on v7x).
    vmem_limit_bytes = int(
        min(
            48 * 1024 * 1024,
            2 * block_m * l * x_itemsize                     # x tiles (double-buffered)
            + 2 * block_m * max(c, 128) * out_itemsize       # output tiles (lane-padded worst case)
            + 2 * ((l * d + d * c) * 2 + (d + c) * 4)        # bf16 weights + f32 biases
            + 3 * block_m * d * 4                            # f32 h + bf16/transposed staging
            + 8 * 1024 * 1024,                               # headroom / spills
        )
    )

    cost = pl.CostEstimate(
        flops=2 * n * l * d + 2 * n * d * c,
        transcendentals=n * d,
        bytes_accessed=(
            n * l * x_itemsize
            + (l * d + d * c) * 2 + (d + c) * 4
            + n * c * out_itemsize
        ),
    )

    out = pl.pallas_call(
        functools.partial(attn_net_kernel, lane_dense_out=lane_dense_out),
        grid=grid,
        in_specs=in_specs,
        out_specs=out_spec,
        out_shape=out_shape,
        compiler_params=pltpu.CompilerParams(
            dimension_semantics=("parallel",),  # megacore sharding on v7x; no-op on v5e/v6e
            vmem_limit_bytes=vmem_limit_bytes,
        ),
        cost_estimate=cost,
    )(x, w1_b, b1_f, w2_b, b2_f)

    if lane_dense_out:
        a = out[0, :n].reshape(n, 1)
    else:
        a = out
    return a, x


def attn_net_reference(x, w1, b1, w2, b2):
    """Plain-JAX reference mirroring the kernel's bf16-MXU / f32-accumulate compute."""
    h = jnp.dot(
        x.astype(jnp.bfloat16), w1.astype(jnp.bfloat16), preferred_element_type=jnp.float32
    )
    h = jnp.tanh(h + b1.reshape(1, -1).astype(jnp.float32))
    a = jnp.dot(
        h.astype(jnp.bfloat16), w2.astype(jnp.bfloat16), preferred_element_type=jnp.float32
    )
    return a + b2.reshape(1, -1).astype(jnp.float32)


def attn_net_reference_f32(x, w1, b1, w2, b2):
    """Pure-f32 reference with the exact torch-module semantics."""
    h = jnp.tanh(x @ w1 + b1.reshape(1, -1))
    return h @ w2 + b2.reshape(1, -1)


def init_params(key, L, D, n_classes, dtype=jnp.float32):
    """Deterministic synthetic parameters (shapes transposed vs torch.nn.Linear)."""
    k1, k2, k3, k4 = jax.random.split(key, 4)
    w1 = (jax.random.normal(k1, (L, D), dtype) * (1.0 / jnp.sqrt(L))).astype(dtype)
    b1 = (jax.random.normal(k2, (1, D), dtype) * 0.01).astype(dtype)
    w2 = (jax.random.normal(k3, (D, n_classes), dtype) * (1.0 / jnp.sqrt(D))).astype(dtype)
    b2 = (jax.random.normal(k4, (1, n_classes), dtype) * 0.01).astype(dtype)
    return w1, b1, w2, b2


# TODO(synk): the optional nn.Dropout(0.25) (constructor arg dropout=True) is not
# implemented; it could be added with pltpu.prng_seed / pltpu.stateful_bernoulli if needed.


if __name__ == "__main__":
    key = jax.random.PRNGKey(0)
    kx, kp, kx2, kp2, kx3 = jax.random.split(key, 5)

    # Case 1: default Attn_Net (L=1024, D=256, n_classes=1) -> lane-dense second stage.
    N, L, D, C = 512, 1024, 256, 1
    x = jax.random.normal(kx, (N, L), jnp.float32)
    w1, b1, w2, b2 = init_params(kp, L, D, C)

    a, x_out = attn_net_forward(x, w1, b1, w2, b2)
    a = jax.block_until_ready(a)
    x_out = jax.block_until_ready(x_out)

    assert a.shape == (N, C) and x_out.shape == (N, L)
    a_ref = attn_net_reference(x, w1, b1, w2, b2)
    a_f32 = attn_net_reference_f32(x, w1, b1, w2, b2)
    assert jnp.allclose(a, a_ref, atol=1e-2, rtol=1e-2), float(jnp.max(jnp.abs(a - a_ref)))
    # Loose semantic check vs pure-f32 torch math (bf16 MXU inputs -> ~1e-2 abs error).
    assert jnp.allclose(a, a_f32, atol=1e-1, rtol=1e-1), float(jnp.max(jnp.abs(a - a_f32)))
    assert jnp.array_equal(x_out, x)

    # Case 2: ragged N (not a tile multiple, no wrapper-side pad) and n_classes > 1.
    N2, C2 = 77, 4
    x2 = jax.random.normal(kx2, (N2, L), jnp.float32)
    w1b, b1b, w2b, b2b = init_params(kp2, L, D, C2)

    a2, x2_out = attn_net_forward(x2, w1b, b1b, w2b, b2b)
    a2 = jax.block_until_ready(a2)

    assert a2.shape == (N2, C2) and x2_out.shape == (N2, L)
    a2_ref = attn_net_reference(x2, w1b, b1b, w2b, b2b)
    assert jnp.allclose(a2, a2_ref, atol=1e-2, rtol=1e-2), float(jnp.max(jnp.abs(a2 - a2_ref)))
    assert jnp.array_equal(x2_out, x2)

    # Case 3: bf16 activations end-to-end (recommended production contract; kernel cast
    # becomes a no-op, halving the dominant HBM read stream; A comes back in bf16).
    N3 = 300
    x3 = jax.random.normal(kx3, (N3, L), jnp.float32).astype(jnp.bfloat16)
    a3, x3_out = attn_net_forward(x3, w1, b1, w2, b2)
    a3 = jax.block_until_ready(a3)

    assert a3.shape == (N3, C) and a3.dtype == jnp.bfloat16
    a3_ref = attn_net_reference(x3.astype(jnp.float32), w1, b1, w2, b2)
    assert jnp.allclose(a3.astype(jnp.float32), a3_ref, atol=5e-2, rtol=5e-2), float(
        jnp.max(jnp.abs(a3.astype(jnp.float32) - a3_ref))
    )
    assert jnp.array_equal(x3_out, x3)

    print("KERNEL_OK")
</pallas_src>

<mosaic_0001>
module attributes {stable_mosaic.version = 11 : i64} {
  func.func @attn_net_kernel(%arg0: i32, %arg1: memref<256x1024xf32, #tpu.memory_space<vmem>>, %arg2: memref<1024x256xbf16, #tpu.memory_space<vmem>>, %arg3: memref<1x256xf32, #tpu.memory_space<vmem>>, %arg4: memref<1x256xbf16, #tpu.memory_space<vmem>>, %arg5: memref<1x1xf32, #tpu.memory_space<vmem>>, %arg6: memref<1x256xf32, #tpu.memory_space<vmem>>) attributes {dimension_semantics = [#tpu.dimension_semantics<parallel>], iteration_bounds = array<i64: 2>, scalar_prefetch = 0 : i64, scratch_operands = 0 : i64, tpu.core_type = #tpu.core_type<tc>, window_params = [{transform_indices = @transform_0, window_bounds = array<i64: 256, 1024>}, {pipeline_mode = #tpu.pipeline_mode<synchronous>, transform_indices = @transform_1, window_bounds = array<i64: 1024, 256>}, {pipeline_mode = #tpu.pipeline_mode<synchronous>, transform_indices = @transform_2, window_bounds = array<i64: 1, 256>}, {pipeline_mode = #tpu.pipeline_mode<synchronous>, transform_indices = @transform_3, window_bounds = array<i64: 1, 256>}, {pipeline_mode = #tpu.pipeline_mode<synchronous>, transform_indices = @transform_4, window_bounds = array<i64: 1, 1>}, {transform_indices = @transform_5, window_bounds = array<i64: 1, 256>}]} {
    %c0 = arith.constant 0 : index
    %c0_0 = arith.constant 0 : index
    %0 = vector.load %arg1[%c0, %c0_0] : memref<256x1024xf32, #tpu.memory_space<vmem>>, vector<256x1024xf32>
    %1 = arith.truncf %0 : vector<256x1024xf32> to vector<256x1024xbf16>
    %c0_1 = arith.constant 0 : index
    %c0_2 = arith.constant 0 : index
    %2 = vector.load %arg2[%c0_1, %c0_2] : memref<1024x256xbf16, #tpu.memory_space<vmem>>, vector<1024x256xbf16>
    %cst = arith.constant dense<0.000000e+00> : vector<256x256xf32>
    %3 = tpu.matmul %1, %2, %cst {dimension_numbers = #tpu.dot_dimension_numbers<[1], [0], [0], [1], [0, 0, 1, 1], [], []>} : vector<256x1024xbf16>, vector<1024x256xbf16>, vector<256x256xf32> -> vector<256x256xf32>
    %c0_3 = arith.constant 0 : index
    %c0_4 = arith.constant 0 : index
    %4 = vector.load %arg3[%c0_3, %c0_4] : memref<1x256xf32, #tpu.memory_space<vmem>>, vector<1x256xf32>
    %5 = vector.broadcast %4 : vector<1x256xf32> to vector<256x256xf32>
    %6 = arith.addf %3, %5 : vector<256x256xf32>
    %7 = math.tanh %6 : vector<256x256xf32>
    %c0_5 = arith.constant 0 : index
    %c0_6 = arith.constant 0 : index
    %8 = vector.load %arg4[%c0_5, %c0_6] : memref<1x256xbf16, #tpu.memory_space<vmem>>, vector<1x256xbf16>
    %9 = arith.truncf %7 : vector<256x256xf32> to vector<256x256xbf16>
    %cst_7 = arith.constant dense<0.000000e+00> : vector<1x256xf32>
    %10 = tpu.matmul %8, %9, %cst_7 {dimension_numbers = #tpu.dot_dimension_numbers<[1], [1], [0], [0], [0, 0, 1, 0], [], []>} : vector<1x256xbf16>, vector<256x256xbf16>, vector<1x256xf32> -> vector<1x256xf32>
    %c0_8 = arith.constant 0 : index
    %c0_9 = arith.constant 0 : index
    %11 = vector.load %arg5[%c0_8, %c0_9] : memref<1x1xf32, #tpu.memory_space<vmem>>, vector<1x1xf32>
    %12 = vector.broadcast %11 : vector<1x1xf32> to vector<1x256xf32>
    %13 = arith.addf %10, %12 : vector<1x256xf32>
    %c0_10 = arith.constant 0 : index
    %c0_11 = arith.constant 0 : index
    %14 = vector.load %arg6[%c0_10, %c0_11] : memref<1x256xf32, #tpu.memory_space<vmem>>, vector<1x256xf32>
    tpu.vector_store %arg6[%c0_10, %c0_11], %13 {strides = array<i32>} : memref<1x256xf32, #tpu.memory_space<vmem>>, vector<1x256xf32>,
    return
  }
  func.func @transform_0(%arg0: i32) -> (i32, i32) {
    %c0_i32 = arith.constant 0 : i32
    %c0_i32_0 = arith.constant 0 : i32
    return %arg0, %c0_i32 : i32, i32
  }
  func.func @transform_1(%arg0: i32) -> (i32, i32) {
    %c0_i32 = arith.constant 0 : i32
    %c0_i32_0 = arith.constant 0 : i32
    %c0_i32_1 = arith.constant 0 : i32
    return %c0_i32, %c0_i32_0 : i32, i32
  }
  func.func @transform_2(%arg0: i32) -> (i32, i32) {
    %c0_i32 = arith.constant 0 : i32
    %c0_i32_0 = arith.constant 0 : i32
    %c0_i32_1 = arith.constant 0 : i32
    return %c0_i32, %c0_i32_0 : i32, i32
  }
  func.func @transform_3(%arg0: i32) -> (i32, i32) {
    %c0_i32 = arith.constant 0 : i32
    %c0_i32_0 = arith.constant 0 : i32
    %c0_i32_1 = arith.constant 0 : i32
    return %c0_i32, %c0_i32_0 : i32, i32
  }
  func.func @transform_4(%arg0: i32) -> (i32, i32) {
    %c0_i32 = arith.constant 0 : i32
    %c0_i32_0 = arith.constant 0 : i32
    %c0_i32_1 = arith.constant 0 : i32
    return %c0_i32, %c0_i32_0 : i32, i32
  }
  func.func @transform_5(%arg0: i32) -> (i32, i32) {
    %c0_i32 = arith.constant 0 : i32
    %c0_i32_0 = arith.constant 0 : i32
    return %c0_i32, %arg0 : i32, i32
  }
}

</mosaic_0001>

<bundles_post_ra>
// kernel: tpu_custom_call.1
= control target key start
LH: loop header
LB: loop body
LE: loop exit
PB: predicated region body
PF: predicated region fallthrough
CT: control target
= control target key end

     0   :  { %s4187_s0 = inlined_call_operand.hbm [shape: f32[512,1024], index: 0, kind: input, shape index: {}]   ;;  %s4188_s1 = inlined_call_operand.hbm [shape: bf16[1024,256], index: 1, kind: input, shape index: {}]   ;;  %s4189_s2 = inlined_call_operand.hbm [shape: f32[1,256], index: 2, kind: input, shape index: {}]   ;;  %s4190_s3 = inlined_call_operand.hbm [shape: bf16[1,256], index: 3, kind: input, shape index: {}]   ;;  %s4191_s4 = inlined_call_operand.<no memory space> [shape: f32[1,1], index: 4, kind: input, shape index: {}]   ;;  %s4192_s5 = inlined_call_operand.hbm [shape: f32[1,512], index: 5, kind: output, shape index: {}]  }
   0x1   :  { %v10_v0 = vstv %s4191_s4 }
   0x2   :  { %11 = vst [vmem:[#allocation2] sm:$0x1] %v10_v0 }
   0x3   :  { %12 = vsyncpa [#allocation4], 0 }
   0x4   :  { %14 = vsyncpa [#allocation4 + $0x1], 0 }
   0x5   :  { %15 = vsyncpa [#allocation7], 0 }
   0x6   :  { %16 = vsyncpa [#allocation10], 0 }
   0x7   :  { %17 = vsyncpa [#allocation5], 0 }
   0x8   :  { %19 = vsyncpa [#allocation5 + $0x1], 0  ;;  %s3581_s20 = smov 0   ;;  %s3583_s21 = smov 0  }
   0x9   :  { %s3585_s22 = smov 0   ;;  %s3587_s23 = smov 0  }
   0xa LB: > { %s3602_s4 = sadd.s32 4294967295, %s3535_s23   ;;  %s2534_s24 = sadd.s32 4294967294, %s3535_s23   ;;  %s3535_s23 = sphi %s3587_s23, %s4215_s23   ;;  %s3531_s22 = sphi %s3585_s22, %s4214_s22   ;;  %s3527_s21 = sphi %s3583_s21, %s4213_s21   ;;  %s3523_s20 = sphi %s3581_s20, %s4212_s20  }
   0xb   : > { %p45_p0 = scmp.ne.s32.totalorder %s3527_s21, %s3523_s20  ;;  %p4193_p1 = scmp.eq.s32.totalorder %s3602_s4, 0 }
   0xc   : > { %p159_p3 = scmp.eq.s32.totalorder %s2534_s24, 1  ;;  %p2535_p5 = scmp.ge.s32.totalorder %s3535_s23, 1 }
   0xd   : > { %p3611_p4 = por %p4193_p1, %p45_p0  ;;  %p166_p7 = scmp.lt.s32.totalorder %s3535_s23, 3 }
   0xe   : > { %p3616_p6 = por %p159_p3, %p45_p0  ;;  %s3537_s28 = smov [#allocation6]  }
   0xf   : > { %s4196_s25 = scalar_select %p3611_p4, 1, 0 }
  0x10   : > { %s4197_s26 = scalar_select %p3616_p6, 1, 0 }
  0x11   : > { %p3621_p8 = pnand %p2535_p5, %p166_p7  ;;  %s178_s29 = sshll.u32 %s3537_s28, 4  ;;  %s3625_s29 = int_to_ptr.vmem [resolvable:$true] %s178_s29 }
  0x12   : > { %s3538_s6 = smov [#allocation8]   ;;  %s3539_s8 = smov [#allocation9]  }
  0x13   : > { %s4198_s27 = scalar_select %p3621_p8, 1, 0 }
  0x14   : > { %p2959_p9 = pneg %p3621_p8  ;;  %s192_s7 = sshll.u32 %s3538_s6, 4  ;;  %s3636_s7 = int_to_ptr.vmem [resolvable:$true] %s192_s7 }
  0x15   : > { %s3638_s9 = sshll.u32 %s3539_s8, 4  ;;  %s3347_s12 = scalar_lea.hbm %s4188_s1, 16384  ;;  %s204_s9 = int_to_ptr.vmem [resolvable:$true] %s3638_s9 }
  0x16   : > { %p3632_p11 = pnand %p2959_p9, %p4193_p1  ;;  %p3348_p12 = scmp.ne.s32.totalorder %s4188_s1, %s3347_s12 }
  0x17   : > { %p3354_p5 = scmp.lt.u32.totalorder %s3347_s12, %s4188_s1 }
  0x18   : > { %p3648_p13 = pneg %p3632_p11 }
  0x1a   : > { %p3350_p0 = pnand %p3648_p13, %p3348_p12 }
  0x1c   : > { %p3351_p3 = pneg %p3350_p0 }
  0x1e   : > { %p3356_p7 = pnand %p3354_p5, %p3351_p3 }
  0x20   : > { %3359 = shalt.err (!%p3356_p7)
}
  0x21   : > { %s3360_s18 = scalar_lea.vmem %s3625_s29, 16384  ;;  %p3368_p2 = scmp.lt.s32.totalorder %s3625_s29, %s3625_s29 }
  0x22   : > { %p3361_p9 = scmp.ne.s32.totalorder %s3625_s29, %s3360_s18  ;;  %p3369_p6 = scmp.lt.s32.totalorder %s3360_s18, %s3360_s18 }
  0x24   : > { %p3363_p10 = pnand %p3361_p9, %p3648_p13  ;;  %p3370_p12 = por %p3369_p6, %p3368_p2 }
  0x26   : > { %p3364_p1 = pneg %p3363_p10 }
  0x28   : > { %p3371_p0 = pnand %p3370_p12, %p3364_p1 }
  0x2a   : > { %3374 = shalt.err (!%p3371_p0)
}
  0x2b   : > { %s3540_s19 = smov 128   ;;  %s3541_s24 = smov 8  }
  0x2c   : > { %2962 = dma.hbm_to_vmem [thread:$0]  (!%p3632_p11), %s4188_s1, 16384, %s3625_s29, [#allocation7], %s3540_s19, %s3540_s19, %s3541_s24  }
  0x2d   : > { %s3375_s11 = scalar_lea.hbm %s4189_s2, 32 }
  0x2e   : > { %p3376_p2 = scmp.ne.s32.totalorder %s4189_s2, %s3375_s11  ;;  %p3382_p10 = scmp.lt.u32.totalorder %s3375_s11, %s4189_s2 }
  0x30   : > { %p3378_p1 = pnand %p3376_p2, %p3648_p13 }
  0x32   : > { %p3379_p6 = pneg %p3378_p1 }
  0x34   : > { %p3384_p3 = pnand %p3382_p10, %p3379_p6 }
  0x36   : > { %3387 = shalt.err (!%p3384_p3)
}
  0x37   : > { %s3388_s29 = scalar_lea.vmem %s3636_s7, 32  ;;  %p3396_p12 = scmp.lt.s32.totalorder %s3636_s7, %s3636_s7 }
  0x38   : > { %p3389_p5 = scmp.ne.s32.totalorder %s3636_s7, %s3388_s29  ;;  %p3397_p0 = scmp.lt.s32.totalorder %s3388_s29, %s3388_s29 }
  0x3a   : > { %p3391_p7 = pnand %p3389_p5, %p3648_p13  ;;  %p3398_p2 = por %p3397_p0, %p3396_p12 }
  0x3c   : > { %p3392_p9 = pneg %p3391_p7 }
  0x3e   : > { %p3399_p1 = pnand %p3398_p2, %p3392_p9 }
  0x40   : > { %3402 = shalt.err (!%p3399_p1)
}
  0x41   : > { %2965 = dma.hbm_to_vmem [thread:$0]  (!%p3632_p11), %s4189_s2, 32, %s3636_s7, [#allocation7]  }
  0x42   : > { %s3403_s28 = scalar_lea.hbm %s4190_s3, 32 }
  0x43   : > { %p3404_p6 = scmp.ne.s32.totalorder %s4190_s3, %s3403_s28  ;;  %p3410_p5 = scmp.lt.u32.totalorder %s3403_s28, %s4190_s3 }
  0x45   : > { %p3406_p10 = pnand %p3404_p6, %p3648_p13 }
  0x47   : > { %p3407_p3 = pneg %p3406_p10 }
  0x49   : > { %p3412_p7 = pnand %p3410_p5, %p3407_p3 }
  0x4b   : > { %3415 = shalt.err (!%p3412_p7)
}
  0x4c   : > { %s3416_s12 = scalar_lea.vmem %s204_s9, 32  ;;  %p3424_p2 = scmp.lt.s32.totalorder %s204_s9, %s204_s9 }
  0x4d   : > { %p3417_p9 = scmp.ne.s32.totalorder %s204_s9, %s3416_s12  ;;  %p3425_p1 = scmp.lt.s32.totalorder %s3416_s12, %s3416_s12 }
  0x4f   : > { %p3419_p12 = pnand %p3417_p9, %p3648_p13  ;;  %p3426_p4 = por %p3425_p1, %p3424_p2 }
  0x51   : > { %p3420_p0 = pneg %p3419_p12 }
  0x53   : > { %p3427_p8 = pnand %p3426_p4, %p3420_p0 }
  0x55   : > { %3430 = shalt.err (!%p3427_p8)
}
  0x56   : > { %2968 = dma.hbm_to_vmem [thread:$0]  (!%p3632_p11), %s4190_s3, 32, %s204_s9, [#allocation10]  }
  0x57   : > { %s3712_s15 = sadd.s32 1, %s3535_s23   ;;  %s32_s30 = sadd.s32 1, %s3531_s22 }
  0x58   : > { %s29_s14 = ssub.s32 %s3535_s23, %s3712_s15  ;;  %p39_p8 = scmp.ne.s32.totalorder %s3531_s22, %s3527_s21 }
  0x59   : > { %p30_p4 = scmp.eq.s32.totalorder %s29_s14, 0  ;;  %p40_p13 = scmp.eq.s32.totalorder %s3535_s23, 0 }
  0x5a   : > { %p2980_p6 = scmp.lt.s32.totalorder %s3535_s23, 2  ;;  %p4201_p3 = scmp.eq.s32.totalorder %s3602_s4, 1 }
  0x5b   : > { %s3722_s16 = scalar_select %p30_p4, %s3531_s22, %s32_s30  }
  0x5c   : > { %p41_p10 = por %p40_p13, %p39_p8  ;;  %p3726_p5 = por %p4201_p3, %p39_p8 }
  0x5d   : > { %s217_s17 = sand.u32 1, %s3531_s22   ;;  %s2685_s18 = sshll.u32 %s3535_s23, 15 }
  0x5e   : > { %s2540_s9 = sshll.u32 %s217_s17, 11  ;;  %s3735_s28 = scalar_lea.hbm %s4187_s0, %s2685_s18 }
  0x5f   : > { %s221_s6 = scalar_lea.vmem [#allocation3], %s2540_s9  ;;  %p3737_p11 = pnand %p2980_p6, %p41_p10 }
  0x60   : > { %s229_s8 = sshll.u32 %s221_s6, 4  ;;  %s3743_s11 = scalar_lea.sflag [#allocation4], %s217_s17  ;;  %s3741_s8 = int_to_ptr.vmem [resolvable:$true] %s229_s8 }
  0x61   : > { %s3431_s12 = scalar_lea.hbm %s3735_s28, 32768  ;;  %p3433_p9 = pneg %p3737_p11 }
  0x62   : > { %p3432_p7 = scmp.ne.s32.totalorder %s3735_s28, %s3431_s12  ;;  %s3436_s14 = scalar_lea.hbm %s4187_s0, 65536 }
  0x63   : > { %p3437_p2 = scmp.lt.u32.totalorder %s3735_s28, %s4187_s0  ;;  %p3438_p1 = scmp.lt.u32.totalorder %s3436_s14, %s3431_s12 }
  0x64   : > { %p3434_p12 = pnand %p3433_p9, %p3432_p7  ;;  %p3440_p8 = scmp.lt.u32.totalorder %s3431_s12, %s3735_s28 }
  0x65   : > { %p3439_p4 = por %p3438_p1, %p3437_p2 }
  0x66   : > { %p3435_p0 = pneg %p3434_p12 }
  0x67   : > { %p3441_p13 = por %p3440_p8, %p3439_p4 }
  0x69   : > { %p3442_p6 = pnand %p3441_p13, %p3435_p0 }
  0x6b   : > { %3445 = shalt.err (!%p3442_p6)
}
  0x6c   : > { %s3446_s17 = scalar_lea.vmem %s3741_s8, 32768  ;;  %s3542_s9 = smov [#allocation3]  }
  0x6d   : > { %p3447_p10 = scmp.ne.s32.totalorder %s3741_s8, %s3446_s17  ;;  %s3451_s19 = sshll.u32 %s3542_s9, 4  ;;  %s3452_s19 = int_to_ptr.vmem [resolvable:$false] %s3451_s19 }
  0x6e   : > { %s3453_s24 = scalar_lea.vmem %s3452_s19, 65536  ;;  %p3454_p12 = scmp.lt.s32.totalorder %s3741_s8, %s3452_s19 }
  0x6f   : > { %p3449_p3 = pnand %p3447_p10, %p3433_p9  ;;  %p3455_p2 = scmp.lt.s32.totalorder %s3453_s24, %s3446_s17 }
  0x71   : > { %p3450_p7 = pneg %p3449_p3  ;;  %p3456_p1 = por %p3455_p2, %p3454_p12 }
  0x73   : > { %p3457_p4 = pnand %p3456_p1, %p3450_p7 }
  0x75   : > { %3460 = shalt.err (!%p3457_p4)
}
  0x76   : > { %s3543_s6 = smov 1024   ;;  %s3544_s12 = smov 64  }
  0x77   : > { %2972 = dma.hbm_to_vmem [thread:$0]  (!%p3737_p11), %s3735_s28, 32768, %s3741_s8, %s3743_s11, %s3543_s6, %s3543_s6, %s3544_s12  }
  0x78   : > { %p4204_p9 = scmp.ne.s32.totalorder %s4198_s27, 0 }
  0x79   : > { %s3774_s7 = sand.u32 (!%p4204_p9), 1, %s3527_s21   ;;  %p4205_p0 = scmp.ne.s32.totalorder (!%p4204_p9), %s4196_s25, 0 }
  0x7a   : > { %241 = sbr.rel (%p4204_p9) target bundleno = 927 (0x39f), region = 40  ;;  %s2545_s13 = sshll.u32 (!%p4204_p9), %s3774_s7, 11 }
  0x7b   : > { %s244_s14 = scalar_lea.sflag (!%p4204_p9), [#allocation4], %s3774_s7  ;;  %s3778_s30 = scalar_lea.vmem (!%p4204_p9), [#allocation3], %s2545_s13 }
  0x81   : > { %3506 = dma.done.wait (%p4205_p0), %s244_s14, 32768  }
  0x82   : > { %3508 = vsyncadd (%p4205_p0), %s244_s14, 4294934528  ;;  %p4206_p11 = scmp.eq.s32.totalorder %s3602_s4, 0 }
  0x84   : > { %3510 = dma.done.wait (%p4206_p11), [#allocation7], 16416   ;;  %p4207_p8 = pmov %p4206_p11 }
  0x86   : > { %3512 = vsyncadd (%p4207_p8), [#allocation7], 4294950880  ;;  %p4208_p13 = pmov %p4207_p8 }
  0x87   : > { %p4209_p6 = pmov %p4207_p8 }
  0x88   : > { %3514 = dma.done.wait (%p4208_p13), [#allocation10], 32  }
  0x89   : > { %3516 = vsyncadd (%p4209_p6), [#allocation10], 4294967264  ;;  %v3027_v1 = vld [vmem:[#allocation6 + $0x4] ss:$8 sps:$4 sm:$0xff]   ;;  %v3031_v3 = vld [vmem:[#allocation6] ss:$8 sps:$4 sm:$0xff]  }
  0x8a   : > { %v3029_v2 = vld [vmem:[#allocation6 + $0x204] ss:$8 sps:$4 sm:$0xff]   ;;  %1452 = vmatprep.subr.bf16.mxu1 %v3027_v1  ;;  %v3032_v4 = vld [vmem:[#allocation6 + $0x200] ss:$8 sps:$4 sm:$0xff]   ;;  %v3033_v5 = vld [vmem:[#allocation6 + $0x14] ss:$8 sps:$4 sm:$0xff]  }
  0x8b   : > { %1838 = vmatprep.subr.bf16.mxu0 %v3029_v2  ;;  %1453 = vmatpush1.bf16.msra.mxu1 %v3031_v3  ;;  %v3035_v6 = vld [vmem:[#allocation6 + $0x214] ss:$8 sps:$4 sm:$0xff]   ;;  %v3037_v7 = vld [vmem:[#allocation6 + $0x10] ss:$8 sps:$4 sm:$0xff]   ;;  %v3039_v9 = vld [vmem:[#allocation6 + $0x24] ss:$8 sps:$4 sm:$0xff]  }
  0x8c   : > { %1839 = vmatpush1.bf16.msra.mxu0 %v3032_v4  ;;  %1454 = vmatprep.subr.bf16.mxu1 %v3033_v5  ;;  %v3038_v8 = vld [vmem:[#allocation6 + $0x210] ss:$8 sps:$4 sm:$0xff]   ;;  %v3041_v10 = vld [vmem:[#allocation6 + $0x224] ss:$8 sps:$4 sm:$0xff]   ;;  %v3043_v11 = vld [vmem:[#allocation6 + $0x20] ss:$8 sps:$4 sm:$0xff]  }
  0x8d   : > { %1840 = vmatprep.subr.bf16.mxu0 %v3035_v6  ;;  %v3044_v12 = vld [vmem:[#allocation6 + $0x220] ss:$8 sps:$4 sm:$0xff]   ;;  %v3045_v13 = vld [vmem:[#allocation6 + $0x34] ss:$8 sps:$4 sm:$0xff]   ;;  %v3049_v15 = vld [vmem:[#allocation6 + $0x30] ss:$8 sps:$4 sm:$0xff]  }
  0x8e   : > { %v3047_v14 = vld [vmem:[#allocation6 + $0x234] ss:$8 sps:$4 sm:$0xff]   ;;  %v3050_v16 = vld [vmem:[#allocation6 + $0x230] ss:$8 sps:$4 sm:$0xff]   ;;  %v3051_v17 = vld [vmem:[#allocation6 + $0x44] ss:$8 sps:$4 sm:$0xff]  }
  0x8f   : > { %1455 = vmatpush1.bf16.msra.mxu1 %v3037_v7  ;;  %v3053_v18 = vld [vmem:[#allocation6 + $0x244] ss:$8 sps:$4 sm:$0xff]   ;;  %v3055_v19 = vld [vmem:[#allocation6 + $0x40] ss:$8 sps:$4 sm:$0xff]   ;;  %v3057_v21 = vld [vmem:[#allocation6 + $0x54] ss:$8 sps:$4 sm:$0xff]  }
  0x90   : > { %1841 = vmatpush1.bf16.msra.mxu0 %v3038_v8  ;;  %1456 = vmatprep.subr.bf16.mxu1 %v3039_v9  ;;  %v3056_v20 = vld [vmem:[#allocation6 + $0x240] ss:$8 sps:$4 sm:$0xff]   ;;  %v3059_v22 = vld [vmem:[#allocation6 + $0x254] ss:$8 sps:$4 sm:$0xff]   ;;  %v3061_v23 = vld [vmem:[#allocation6 + $0x50] ss:$8 sps:$4 sm:$0xff]  }
  0x91   : > { %1842 = vmatprep.subr.bf16.mxu0 %v3041_v10  ;;  %v3062_v24 = vld [vmem:[#allocation6 + $0x250] ss:$8 sps:$4 sm:$0xff]   ;;  %v3063_v25 = vld [vmem:[#allocation6 + $0x64] ss:$8 sps:$4 sm:$0xff]   ;;  %v3067_v27 = vld [vmem:[#allocation6 + $0x60] ss:$8 sps:$4 sm:$0xff]  }
  0x92   : > { %v3065_v26 = vld [vmem:[#allocation6 + $0x264] ss:$8 sps:$4 sm:$0xff]   ;;  %v3068_v28 = vld [vmem:[#allocation6 + $0x260] ss:$8 sps:$4 sm:$0xff]   ;;  %v3069_v29 = vld [vmem:[#allocation6 + $0x74] ss:$8 sps:$4 sm:$0xff]  }
  0x93   : > { %1457 = vmatpush1.bf16.msra.mxu1 %v3043_v11  ;;  %v3071_v30 = vld [vmem:[#allocation6 + $0x274] ss:$8 sps:$4 sm:$0xff]   ;;  %v3073_v31 = vld [vmem:[#allocation6 + $0x70] ss:$8 sps:$4 sm:$0xff]   ;;  %v3075_v33 = vld [vmem:[#allocation6 + $0x84] ss:$8 sps:$4 sm:$0xff]  }
  0x94   : > { %1843 = vmatpush1.bf16.msra.mxu0 %v3044_v12  ;;  %1458 = vmatprep.subr.bf16.mxu1 %v3045_v13  ;;  %v3074_v32 = vld [vmem:[#allocation6 + $0x270] ss:$8 sps:$4 sm:$0xff]   ;;  %v3077_v34 = vld [vmem:[#allocation6 + $0x284] ss:$8 sps:$4 sm:$0xff]   ;;  %v3079_v35 = vld [vmem:[#allocation6 + $0x80] ss:$8 sps:$4 sm:$0xff]  }
  0x95   : > { %1844 = vmatprep.subr.bf16.mxu0 %v3047_v14  ;;  %v3080_v36 = vld [vmem:[#allocation6 + $0x280] ss:$8 sps:$4 sm:$0xff]   ;;  %v3081_v37 = vld [vmem:[#allocation6 + $0x94] ss:$8 sps:$4 sm:$0xff]   ;;  %v3085_v39 = vld [vmem:[#allocation6 + $0x90] ss:$8 sps:$4 sm:$0xff]  }
  0x96   : > { %v3083_v38 = vld [vmem:[#allocation6 + $0x294] ss:$8 sps:$4 sm:$0xff]   ;;  %v3086_v40 = vld [vmem:[#allocation6 + $0x290] ss:$8 sps:$4 sm:$0xff]   ;;  %v3087_v41 = vld [vmem:[#allocation6 + $0xa4] ss:$8 sps:$4 sm:$0xff]  }
  0x97   : > { %1459 = vmatpush1.bf16.msra.mxu1 %v3049_v15  ;;  %v3089_v42 = vld [vmem:[#allocation6 + $0x2a4] ss:$8 sps:$4 sm:$0xff]   ;;  %v3091_v43 = vld [vmem:[#allocation6 + $0xa0] ss:$8 sps:$4 sm:$0xff]   ;;  %v3093_v45 = vld [vmem:[#allocation6 + $0xb4] ss:$8 sps:$4 sm:$0xff]  }
  0x98   : > { %1845 = vmatpush1.bf16.msra.mxu0 %v3050_v16  ;;  %1460 = vmatprep.subr.bf16.mxu1 %v3051_v17  ;;  %v3092_v44 = vld [vmem:[#allocation6 + $0x2a0] ss:$8 sps:$4 sm:$0xff]   ;;  %v3095_v46 = vld [vmem:[#allocation6 + $0x2b4] ss:$8 sps:$4 sm:$0xff]   ;;  %v3097_v51 = vld [vmem:[#allocation6 + $0xb0] ss:$8 sps:$4 sm:$0xff]  }
  0x99   : > { %1846 = vmatprep.subr.bf16.mxu0 %v3053_v18  ;;  %v289_v47 = vld [vmem:[%s3778_s30 + $0x8] sm:$0xff]  ;;  %v3098_v52 = vld [vmem:[#allocation6 + $0x2b0] ss:$8 sps:$4 sm:$0xff]   ;;  %v3105_v59 = vld [vmem:[#allocation6 + $0xd4] ss:$8 sps:$4 sm:$0xff]   ;;  %s2549_s25 = sshll.u32 %s3774_s7, 1 }
  0x9a   : > { %v297_v48 = vld [vmem:[%s3778_s30 + $0x48] sm:$0xff]  ;;  %v3107_v60 = vld [vmem:[#allocation6 + $0x2d4] ss:$8 sps:$4 sm:$0xff]   ;;  %v3109_v61 = vld [vmem:[#allocation6 + $0xd0] ss:$8 sps:$4 sm:$0xff]   ;;  %s2686_s27 = sshll.u32 %s3602_s4, 5 }
  0x9b   : > { %1461 = vmatpush1.bf16.msra.mxu1 %v3055_v19  ;;  %v293_v49 = vld [vmem:[%s3778_s30 + $0x28] sm:$0xff]  ;;  %v545_v53 = vpack.c.bf16 %v297_v48, %v289_v47  ;;  %v3110_v62 = vld [vmem:[#allocation6 + $0x2d0] ss:$8 sps:$4 sm:$0xff]   ;;  %v3117_v3 = vld [vmem:[#allocation6 + $0xf4] ss:$8 sps:$4 sm:$0xff]   ;;  %s285_s28 = scalar_lea.vmem [#allocation11], %s2549_s25  ;;  %s4143_s18 = scalar_lea.hbm %s4192_s5, %s2686_s27 }
  0x9c   : > { %1847 = vmatpush1.bf16.msra.mxu0 %v3056_v20  ;;  %1462 = vmatprep.subr.bf16.mxu1 %v3057_v21  ;;  %v301_v50 = vld [vmem:[%s3778_s30 + $0x68] sm:$0xff]  ;;  %v3119_v4 = vld [vmem:[#allocation6 + $0x2f4] ss:$8 sps:$4 sm:$0xff]   ;;  %v3121_v5 = vld [vmem:[#allocation6 + $0xf0] ss:$8 sps:$4 sm:$0xff]   ;;  %s2435_s8 = sshll.u32 %s285_s28, 4  ;;  %s4145_s8 = int_to_ptr.vmem [resolvable:$true] %s2435_s8 }
  0x9d   : > { %1848 = vmatprep.subr.bf16.mxu0 %v3059_v22  ;;  %v549_v54 = vpack.c.bf16 %v301_v50, %v293_v49  ;;  %v3099_v55 = vld [vmem:[#allocation6 + $0xc4] ss:$8 sps:$4 sm:$0xff]   ;;  %1484 = vmatprep.mubr.bf16.mxu1 %v545_v53  ;;  %v3103_v57 = vld [vmem:[#allocation6 + $0xc0] ss:$8 sps:$4 sm:$0xff]   ;;  %v3122_v6 = vld [vmem:[#allocation6 + $0x2f0] ss:$8 sps:$4 sm:$0xff]  }
  0x9e   : > { %v3101_v56 = vld [vmem:[#allocation6 + $0x2c4] ss:$8 sps:$4 sm:$0xff]   ;;  %v3104_v58 = vld [vmem:[#allocation6 + $0x2c0] ss:$8 sps:$4 sm:$0xff]   ;;  %v3146_v47 = vld [vmem:[#allocation6 + $0x334] ss:$8 sps:$4 sm:$0xff]  }
  0x9f   : > { %1463 = vmatpush1.bf16.msra.mxu1 %v3061_v23  ;;  %1870 = vmatprep.mubr.bf16.mxu0 %v549_v54  ;;  %v3111_v63 = vld [vmem:[#allocation6 + $0xe4] ss:$8 sps:$4 sm:$0xff]   ;;  %v3115_v1 = vld [vmem:[#allocation6 + $0xe0] ss:$8 sps:$4 sm:$0xff]   ;;  %v3131_v23 = vld [vmem:[#allocation6 + $0x114] ss:$8 sps:$4 sm:$0xff]  }
  0xa0   : > { %1849 = vmatpush1.bf16.msra.mxu0 %v3062_v24  ;;  %1464 = vmatprep.subr.bf16.mxu1 %v3063_v25  ;;  %v3113_v0 = vld [vmem:[#allocation6 + $0x2e4] ss:$8 sps:$4 sm:$0xff]   ;;  %v3116_v2 = vld [vmem:[#allocation6 + $0x2e0] ss:$8 sps:$4 sm:$0xff]   ;;  %v3141_v53 = vld [vmem:[#allocation6 + $0x130] ss:$8 sps:$4 sm:$0xff]  }
  0xa1   : > { %1850 = vmatprep.subr.bf16.mxu0 %v3065_v26  ;;  %v288_v7 = vld [vmem:[%s3778_s30] sm:$0xff]  ;;  %v305_v13 = vld [vmem:[%s3778_s30 + $0x88] sm:$0xff]  ;;  %v3129_v26 = vld [vmem:[#allocation6 + $0x110] ss:$8 sps:$4 sm:$0xff]   ;;  %s2421_s4 = scalar_lea.sflag [#allocation5], %s3774_s7  ;;  %s3461_s17 = scalar_lea.vmem %s4145_s8, 32 }
  0xa2   : > { %v296_v8 = vld [vmem:[%s3778_s30 + $0x40] sm:$0xff]  ;;  %v313_v14 = vld [vmem:[%s3778_s30 + $0xc8] sm:$0xff]  ;;  %v3144_v54 = vld [vmem:[#allocation6 + $0x330] ss:$8 sps:$4 sm:$0xff]   ;;  %p3462_p10 = scmp.ne.s32.totalorder %s4145_s8, %s3461_s17  ;;  %s3547_s9 = smov [#allocation11]  }
  0xa3   : > { %1465 = vmatpush1.bf16.msra.mxu1 %v3067_v27  ;;  %v3125_v9 = vld [vmem:[#allocation6 + $0x104] ss:$8 sps:$4 sm:$0xff]   ;;  %v544_v17 = vpack.c.bf16 %v296_v8, %v288_v7  ;;  %v3123_v19 = vld [vmem:[#allocation6 + $0x100] ss:$8 sps:$4 sm:$0xff]   ;;  %v553_v21 = vpack.c.bf16 %v313_v14, %v305_v13  ;;  %s3465_s19 = sshll.u32 %s3547_s9, 4  ;;  %s3466_s19 = int_to_ptr.vmem [resolvable:$false] %s3465_s19 }
  0xa4   : > { %1851 = vmatpush1.bf16.msra.mxu0 %v3068_v28  ;;  %1466 = vmatprep.subr.bf16.mxu1 %v3069_v29  ;;  %v292_v10 = vld [vmem:[%s3778_s30 + $0x20] sm:$0xff]  ;;  %v309_v15 = vld [vmem:[%s3778_s30 + $0xa8] sm:$0xff]  ;;  %v3134_v29 = vld [vmem:[#allocation6 + $0x314] ss:$8 sps:$4 sm:$0xff]   ;;  %p3463_p3 = pnand %p3462_p10, %p3726_p5  ;;  %s3467_s24 = scalar_lea.vmem %s3466_s19, 64 }
  0xa5   : > { %1852 = vmatprep.subr.bf16.mxu0 %v3071_v30  ;;  %v300_v11 = vld [vmem:[%s3778_s30 + $0x60] sm:$0xff]  ;;  %v317_v16 = vld [vmem:[%s3778_s30 + $0xe8] sm:$0xff]  ;;  %v3132_v30 = vld [vmem:[#allocation6 + $0x310] ss:$8 sps:$4 sm:$0xff]   ;;  %p3468_p12 = scmp.lt.s32.totalorder %s4145_s8, %s3466_s19  ;;  %p3469_p2 = scmp.lt.s32.totalorder %s3467_s24, %s3461_s17 }
  0xa6   : > { %v3128_v12 = vld [vmem:[#allocation6 + $0x304] ss:$8 sps:$4 sm:$0xff]   ;;  %v548_v18 = vpack.c.bf16 %v300_v11, %v292_v10  ;;  %v3126_v20 = vld [vmem:[#allocation6 + $0x300] ss:$8 sps:$4 sm:$0xff]   ;;  %v557_v22 = vpack.c.bf16 %v317_v16, %v309_v15  ;;  %v3156_v10 = vld [vmem:[#allocation6 + $0x350] ss:$8 sps:$4 sm:$0xff]   ;;  %p3464_p7 = pneg %p3463_p3 }
  0xa7   : > { %1467 = vmatpush1.bf16.msra.mxu1 %v3073_v31  ;;  %v304_v24 = vld [vmem:[%s3778_s30 + $0x80] sm:$0xff]  ;;  %v321_v31 = vld [vmem:[%s3778_s30 + $0x108] sm:$0xff]  ;;  %p3470_p1 = por %p3469_p2, %p3468_p12 }
  0xa8   : > { %1853 = vmatpush1.bf16.msra.mxu0 %v3074_v32  ;;  %1468 = vmatprep.subr.bf16.mxu1 %v3075_v33  ;;  %v312_v25 = vld [vmem:[%s3778_s30 + $0xc0] sm:$0xff]  ;;  %v329_v32 = vld [vmem:[%s3778_s30 + $0x148] sm:$0xff] }
  0xa9   : > { %1854 = vmatprep.subr.bf16.mxu0 %v3077_v34  ;;  %v308_v27 = vld [vmem:[%s3778_s30 + $0xa0] sm:$0xff]  ;;  %v325_v33 = vld [vmem:[%s3778_s30 + $0x128] sm:$0xff]  ;;  %p3471_p4 = pnand %p3470_p1, %p3464_p7 }
  0xaa   : > { %v316_v28 = vld [vmem:[%s3778_s30 + $0xe0] sm:$0xff]  ;;  %v333_v34 = vld [vmem:[%s3778_s30 + $0x168] sm:$0xff] }
  0xab   : > { %1469 = vmatpush1.bf16.msra.mxu1 %v3079_v35  ;;  %v3137_v35 = vld [vmem:[#allocation6 + $0x124] ss:$8 sps:$4 sm:$0xff]  }
  0xac   : > { %1855 = vmatpush1.bf16.msra.mxu0 %v3080_v36  ;;  %1470 = vmatprep.subr.bf16.mxu1 %v3081_v37  ;;  %v3140_v36 = vld [vmem:[#allocation6 + $0x324] ss:$8 sps:$4 sm:$0xff]   ;;  %v552_v37 = vpack.c.bf16 %v312_v25, %v304_v24 }
  0xad   : > { %1856 = vmatprep.subr.bf16.mxu0 %v3083_v38  ;;  %v556_v38 = vpack.c.bf16 %v316_v28, %v308_v27  ;;  %v332_v48 = vld [vmem:[%s3778_s30 + $0x160] sm:$0xff]  ;;  %v337_v49 = vld [vmem:[%s3778_s30 + $0x188] sm:$0xff] }
  0xae   : > { %v345_v50 = vld [vmem:[%s3778_s30 + $0x1c8] sm:$0xff]  ;;  %v364_v24 = vld [vmem:[%s3778_s30 + $0x260] sm:$0xff] }
  0xaf   : > { %1471 = vmatpush1.bf16.msra.mxu1 %v3085_v39  ;;  %v561_v39 = vpack.c.bf16 %v329_v32, %v321_v31  ;;  %v357_v7 = vld [vmem:[%s3778_s30 + $0x228] sm:$0xff] }
  0xb0   : > { %1857 = vmatpush1.bf16.msra.mxu0 %v3086_v40  ;;  %1472 = vmatprep.subr.bf16.mxu1 %v3087_v41  ;;  %v565_v40 = vpack.c.bf16 %v333_v34, %v325_v33  ;;  %v3135_v41 = vld [vmem:[#allocation6 + $0x120] ss:$8 sps:$4 sm:$0xff]   ;;  %v3161_v11 = vld [vmem:[#allocation6 + $0x164] ss:$8 sps:$4 sm:$0xff]  }
  0xb1   : > { %1858 = vmatprep.subr.bf16.mxu0 %v3089_v42  ;;  %v3138_v42 = vld [vmem:[#allocation6 + $0x320] ss:$8 sps:$4 sm:$0xff]   ;;  %v3173_v31 = vld [vmem:[#allocation6 + $0x184] ss:$8 sps:$4 sm:$0xff]  }
  0xb2   : > { %v365_v8 = vld [vmem:[%s3778_s30 + $0x268] sm:$0xff] }
  0xb3   : > { %1473 = vmatpush1.bf16.msra.mxu1 %v3091_v43  ;;  %v320_v43 = vld [vmem:[%s3778_s30 + $0x100] sm:$0xff]  ;;  %v581_v16 = vpack.c.bf16 %v365_v8, %v357_v7  ;;  %v369_v25 = vld [vmem:[%s3778_s30 + $0x288] sm:$0xff] }
  0xb4   : > { %1859 = vmatpush1.bf16.msra.mxu0 %v3092_v44  ;;  %1474 = vmatprep.subr.bf16.mxu1 %v3093_v45  ;;  %v328_v44 = vld [vmem:[%s3778_s30 + $0x140] sm:$0xff]  ;;  %v373_v27 = vld [vmem:[%s3778_s30 + $0x2a8] sm:$0xff] }
  0xb5   : > { %1860 = vmatprep.subr.bf16.mxu0 %v3095_v46  ;;  %v324_v45 = vld [vmem:[%s3778_s30 + $0x120] sm:$0xff]  ;;  %v3143_v46 = vld [vmem:[#allocation6 + $0x134] ss:$8 sps:$4 sm:$0xff]   ;;  %v381_v28 = vld [vmem:[%s3778_s30 + $0x2e8] sm:$0xff] }
  0xb6   : > { %v3176_v32 = vld [vmem:[#allocation6 + $0x384] ss:$8 sps:$4 sm:$0xff]  }
  0xb7   : > { %1475 = vmatpush1.bf16.msra.mxu1 %v3097_v51  ;;  %v341_v51 = vld [vmem:[%s3778_s30 + $0x1a8] sm:$0xff] }
  0xb8   : > { %1861 = vmatpush1.bf16.msra.mxu0 %v3098_v52  ;;  %1476 = vmatprep.subr.bf16.mxu1 %v3099_v55  ;;  %v349_v52 = vld [vmem:[%s3778_s30 + $0x1e8] sm:$0xff] }
  0xb9   : > { %1862 = vmatprep.subr.bf16.mxu0 %v3101_v56  ;;  %v3149_v55 = vld [vmem:[#allocation6 + $0x144] ss:$8 sps:$4 sm:$0xff]  }
  0xba   : > { %v3152_v56 = vld [vmem:[#allocation6 + $0x344] ss:$8 sps:$4 sm:$0xff]  }
  0xbb   : > { %1477 = vmatpush1.bf16.msra.mxu1 %v3103_v57  ;;  %v560_v57 = vpack.c.bf16 %v328_v44, %v320_v43  ;;  %v3182_v43 = vld [vmem:[#allocation6 + $0x394] ss:$8 sps:$4 sm:$0xff]   ;;  %v380_v44 = vld [vmem:[%s3778_s30 + $0x2e0] sm:$0xff] }
  0xbc   : > { %1863 = vmatpush1.bf16.msra.mxu0 %v3104_v58  ;;  %1478 = vmatprep.subr.bf16.mxu1 %v3105_v59  ;;  %v564_v58 = vpack.c.bf16 %v332_v48, %v324_v45  ;;  %v569_v59 = vpack.c.bf16 %v345_v50, %v337_v49  ;;  %v385_v45 = vld [vmem:[%s3778_s30 + $0x308] sm:$0xff]  ;;  %v3177_v49 = vld [vmem:[#allocation6 + $0x190] ss:$8 sps:$4 sm:$0xff]  }
  0xbd   : > { %1864 = vmatprep.subr.bf16.mxu0 %v3107_v60  ;;  %v573_v60 = vpack.c.bf16 %v349_v52, %v341_v51  ;;  %v397_v48 = vld [vmem:[%s3778_s30 + $0x368] sm:$0xff]  ;;  %v3180_v50 = vld [vmem:[#allocation6 + $0x390] ss:$8 sps:$4 sm:$0xff]  }
  0xbe   : > { %v3185_v51 = vld [vmem:[#allocation6 + $0x1a4] ss:$8 sps:$4 sm:$0xff]  }
  0xbf   : > { %1479 = vmatpush1.bf16.msra.mxu1 %v3109_v61  ;;  %v3147_v61 = vld [vmem:[#allocation6 + $0x140] ss:$8 sps:$4 sm:$0xff]   ;;  %v3188_v52 = vld [vmem:[#allocation6 + $0x3a4] ss:$8 sps:$4 sm:$0xff]  }
  0xc0   : > { %1865 = vmatpush1.bf16.msra.mxu0 %v3110_v62  ;;  %1480 = vmatprep.subr.bf16.mxu1 %v3111_v63  ;;  %v3150_v62 = vld [vmem:[#allocation6 + $0x340] ss:$8 sps:$4 sm:$0xff]   ;;  %v3155_v63 = vld [vmem:[#allocation6 + $0x154] ss:$8 sps:$4 sm:$0xff]   ;;  %v3197_v7 = vld [vmem:[#allocation6 + $0x1c4] ss:$8 sps:$4 sm:$0xff]  }
  0xc1   : > { %1866 = vmatprep.subr.bf16.mxu0 %v3113_v0  ;;  %v336_v0 = vld [vmem:[%s3778_s30 + $0x180] sm:$0xff] }
  0xc3   : > { %1481 = vmatpush1.bf16.msra.mxu1 %v3115_v1  ;;  %v344_v1 = vld [vmem:[%s3778_s30 + $0x1c0] sm:$0xff] }
  0xc4   : > { %1867 = vmatpush1.bf16.msra.mxu0 %v3116_v2  ;;  %1482 = vmatprep.subr.bf16.mxu1 %v3117_v3  ;;  %v340_v2 = vld [vmem:[%s3778_s30 + $0x1a0] sm:$0xff]  ;;  %v3158_v3 = vld [vmem:[#allocation6 + $0x354] ss:$8 sps:$4 sm:$0xff]   ;;  %v568_v13 = vpack.c.bf16 %v344_v1, %v336_v0  ;;  %v401_v1 = vld [vmem:[%s3778_s30 + $0x388] sm:$0xff] }
  0xc5   : > { %1868 = vmatprep.subr.bf16.mxu0 %v3119_v4  ;;  %v348_v4 = vld [vmem:[%s3778_s30 + $0x1e0] sm:$0xff] }
  0xc6   : > { %v572_v14 = vpack.c.bf16 %v348_v4, %v340_v2  ;;  %v396_v0 = vld [vmem:[%s3778_s30 + $0x360] sm:$0xff]  ;;  %v409_v2 = vld [vmem:[%s3778_s30 + $0x3c8] sm:$0xff] }
  0xc7   : > { %1483 = vmatpush1.bf16.msra.mxu1 %v3121_v5  ;;  %v353_v5 = vld [vmem:[%s3778_s30 + $0x208] sm:$0xff] }
  0xc8   : > { %1869 = vmatpush1.bf16.msra.mxu0 %v3122_v6  ;;  %1645 = vmatprep.subr.bf16.mxu1 %v3125_v9  ;;  %v361_v6 = vld [vmem:[%s3778_s30 + $0x248] sm:$0xff]  ;;  %v3153_v9 = vld [vmem:[#allocation6 + $0x150] ss:$8 sps:$4 sm:$0xff]  }
  0xc9   : > { %2031 = vmatprep.subr.bf16.mxu0 %v3128_v12  ;;  %v3164_v12 = vld [vmem:[#allocation6 + $0x364] ss:$8 sps:$4 sm:$0xff]   ;;  %v577_v15 = vpack.c.bf16 %v361_v6, %v353_v5  ;;  %v3189_v5 = vld [vmem:[#allocation6 + $0x1b0] ss:$8 sps:$4 sm:$0xff]  }
  0xca   : > { %1485 = vmatmul.mubr.bf16.vlgmr.msra.gmra.mrb[0].mxu1 %v544_v17  ;;  %v3159_v17 = vld [vmem:[#allocation6 + $0x160] ss:$8 sps:$4 sm:$0xff]   ;;  %v3192_v6 = vld [vmem:[#allocation6 + $0x3b0] ss:$8 sps:$4 sm:$0xff]  }
  0xcb   : > { %1871 = vmatmul.mubr.bf16.vlgmr.msra.gmra.mrb[0].mxu0 %v548_v18  ;;  %1646 = vmatpush1.bf16.msra.mxu1 %v3123_v19  ;;  %v3162_v18 = vld [vmem:[#allocation6 + $0x360] ss:$8 sps:$4 sm:$0xff]  }
  0xcc   : > { %2032 = vmatpush1.bf16.msra.mxu0 %v3126_v20  ;;  %1494 = vmatprep.mubr.bf16.mxu1 %v553_v21  ;;  %v352_v19 = vld [vmem:[%s3778_s30 + $0x200] sm:$0xff]  ;;  %v413_v4 = vld [vmem:[%s3778_s30 + $0x3e8] sm:$0xff] }
  0xcd   : > { %1880 = vmatprep.mubr.bf16.mxu0 %v557_v22  ;;  %1647 = vmatprep.subr.bf16.mxu1 %v3131_v23  ;;  %v360_v20 = vld [vmem:[%s3778_s30 + $0x240] sm:$0xff]  ;;  %v3167_v22 = vld [vmem:[#allocation6 + $0x174] ss:$8 sps:$4 sm:$0xff]  }
  0xce   : > { %2033 = vmatprep.subr.bf16.mxu0 %v3134_v29  ;;  %v356_v21 = vld [vmem:[%s3778_s30 + $0x220] sm:$0xff]  ;;  %v3170_v23 = vld [vmem:[#allocation6 + $0x374] ss:$8 sps:$4 sm:$0xff]   ;;  %v3165_v29 = vld [vmem:[#allocation6 + $0x170] ss:$8 sps:$4 sm:$0xff]   ;;  %v576_v33 = vpack.c.bf16 %v360_v20, %v352_v19 }
  0xcf   : > { %1648 = vmatpush1.bf16.msra.mxu1 %v3129_v26  ;;  %v377_v26 = vld [vmem:[%s3778_s30 + $0x2c8] sm:$0xff]  ;;  %v580_v34 = vpack.c.bf16 %v364_v24, %v356_v21  ;;  %v3201_v24 = vld [vmem:[#allocation6 + $0x1d0] ss:$8 sps:$4 sm:$0xff]  }
  0xd0   : > { %2034 = vmatpush1.bf16.msra.mxu0 %v3132_v30  ;;  %1649 = vmatprep.subr.bf16.mxu1 %v3137_v35  ;;  %v3168_v30 = vld [vmem:[#allocation6 + $0x370] ss:$8 sps:$4 sm:$0xff]   ;;  %v585_v35 = vpack.c.bf16 %v377_v26, %v369_v25  ;;  %v417_v19 = vld [vmem:[%s3778_s30 + $0x408] sm:$0xff]  ;;  %v3206_v26 = vld [vmem:[#allocation6 + $0x3d4] ss:$8 sps:$4 sm:$0xff]  }
  0xd1   : > { %2035 = vmatprep.subr.bf16.mxu0 %v3140_v36  ;;  %v589_v36 = vpack.c.bf16 %v381_v28, %v373_v27  ;;  %v425_v20 = vld [vmem:[%s3778_s30 + $0x448] sm:$0xff]  ;;  %v3204_v25 = vld [vmem:[#allocation6 + $0x3d0] ss:$8 sps:$4 sm:$0xff]  }
  0xd2   : > { %1495 = vmatmul.mubr.bf16.gmra.mrb[4].mxu1 %v552_v37  ;;  %v3171_v37 = vld [vmem:[#allocation6 + $0x180] ss:$8 sps:$4 sm:$0xff]  }
  0xd3   : > { %1881 = vmatmul.mubr.bf16.gmra.mrb[4].mxu0 %v556_v38  ;;  %1504 = vmatprep.mubr.bf16.mxu1 %v561_v39  ;;  %v3174_v38 = vld [vmem:[#allocation6 + $0x380] ss:$8 sps:$4 sm:$0xff]   ;;  %v3179_v39 = vld [vmem:[#allocation6 + $0x194] ss:$8 sps:$4 sm:$0xff]  }
  0xd4   : > { %1890 = vmatprep.mubr.bf16.mxu0 %v565_v40  ;;  %1650 = vmatpush1.bf16.msra.mxu1 %v3135_v41  ;;  %v368_v40 = vld [vmem:[%s3778_s30 + $0x280] sm:$0xff]  ;;  %v421_v21 = vld [vmem:[%s3778_s30 + $0x428] sm:$0xff] }
  0xd5   : > { %2036 = vmatpush1.bf16.msra.mxu0 %v3138_v42  ;;  %1651 = vmatprep.subr.bf16.mxu1 %v3143_v46  ;;  %v376_v41 = vld [vmem:[%s3778_s30 + $0x2c0] sm:$0xff]  ;;  %v393_v46 = vld [vmem:[%s3778_s30 + $0x348] sm:$0xff] }
  0xd6   : > { %2037 = vmatprep.subr.bf16.mxu0 %v3146_v47  ;;  %v372_v42 = vld [vmem:[%s3778_s30 + $0x2a0] sm:$0xff]  ;;  %v389_v47 = vld [vmem:[%s3778_s30 + $0x328] sm:$0xff] }
  0xd8   : > { %1652 = vmatpush1.bf16.msra.mxu1 %v3141_v53  ;;  %v584_v53 = vpack.c.bf16 %v376_v41, %v368_v40  ;;  %v441_v40 = vld [vmem:[%s3778_s30 + $0x4c8] sm:$0xff] }
  0xd9   : > { %2038 = vmatpush1.bf16.msra.mxu0 %v3144_v54  ;;  %1653 = vmatprep.subr.bf16.mxu1 %v3149_v55  ;;  %v588_v54 = vpack.c.bf16 %v380_v44, %v372_v42  ;;  %v593_v55 = vpack.c.bf16 %v393_v46, %v385_v45  ;;  %v437_v41 = vld [vmem:[%s3778_s30 + $0x4a8] sm:$0xff]  ;;  %v3215_v44 = vld [vmem:[#allocation6 + $0x1f4] ss:$8 sps:$4 sm:$0xff]  }
  0xda   : > { %2039 = vmatprep.subr.bf16.mxu0 %v3152_v56  ;;  %1505 = vmatmul.mubr.bf16.gmra.mrb[8].mxu1 %v560_v57  ;;  %v597_v56 = vpack.c.bf16 %v397_v48, %v389_v47  ;;  %v3183_v57 = vld [vmem:[#allocation6 + $0x1a0] ss:$8 sps:$4 sm:$0xff]   ;;  %v3216_v47 = vld [vmem:[#allocation6 + $0x3f0] ss:$8 sps:$4 sm:$0xff]   ;;  %v3218_v48 = vld [vmem:[#allocation6 + $0x3f4] ss:$8 sps:$4 sm:$0xff]  }
  0xdb   : > { %1891 = vmatmul.mubr.bf16.gmra.mrb[8].mxu0 %v564_v58  ;;  %1514 = vmatprep.mubr.bf16.mxu1 %v569_v59  ;;  %v3186_v58 = vld [vmem:[#allocation6 + $0x3a0] ss:$8 sps:$4 sm:$0xff]  }
  0xdc   : > { %1900 = vmatprep.mubr.bf16.mxu0 %v573_v60  ;;  %1654 = vmatpush1.bf16.msra.mxu1 %v3147_v61  ;;  %v384_v59 = vld [vmem:[%s3778_s30 + $0x300] sm:$0xff]  ;;  %v445_v42 = vld [vmem:[%s3778_s30 + $0x4e8] sm:$0xff] }
  0xdd   : > { %2040 = vmatpush1.bf16.msra.mxu0 %v3150_v62  ;;  %1655 = vmatprep.subr.bf16.mxu1 %v3155_v63  ;;  %v392_v60 = vld [vmem:[%s3778_s30 + $0x340] sm:$0xff]  ;;  %v3191_v62 = vld [vmem:[#allocation6 + $0x1b4] ss:$8 sps:$4 sm:$0xff]  }
  0xde   : > { %2041 = vmatprep.subr.bf16.mxu0 %v3158_v3  ;;  %v388_v61 = vld [vmem:[%s3778_s30 + $0x320] sm:$0xff]  ;;  %v3194_v63 = vld [vmem:[#allocation6 + $0x3b4] ss:$8 sps:$4 sm:$0xff]   ;;  %v405_v3 = vld [vmem:[%s3778_s30 + $0x3a8] sm:$0xff]  ;;  %v592_v8 = vpack.c.bf16 %v392_v60, %v384_v59 }
  0xe0   : > { %1656 = vmatpush1.bf16.msra.mxu1 %v3153_v9  ;;  %v596_v9 = vpack.c.bf16 %v396_v0, %v388_v61  ;;  %v456_v0 = vld [vmem:[%s3778_s30 + $0x540] sm:$0xff] }
  0xe1   : > { %2042 = vmatpush1.bf16.msra.mxu0 %v3156_v10  ;;  %1657 = vmatprep.subr.bf16.mxu1 %v3161_v11  ;;  %v3200_v10 = vld [vmem:[#allocation6 + $0x3c4] ss:$8 sps:$4 sm:$0xff]   ;;  %v601_v11 = vpack.c.bf16 %v409_v2, %v401_v1 }
  0xe2   : > { %2043 = vmatprep.subr.bf16.mxu0 %v3164_v12  ;;  %1515 = vmatmul.mubr.bf16.gmra.mrb[12].mxu1 %v568_v13  ;;  %v605_v12 = vpack.c.bf16 %v413_v4, %v405_v3  ;;  %v3195_v13 = vld [vmem:[#allocation6 + $0x1c0] ss:$8 sps:$4 sm:$0xff]  }
  0xe3   : > { %1901 = vmatmul.mubr.bf16.gmra.mrb[12].mxu0 %v572_v14  ;;  %1524 = vmatprep.mubr.bf16.mxu1 %v577_v15  ;;  %v3198_v14 = vld [vmem:[#allocation6 + $0x3c0] ss:$8 sps:$4 sm:$0xff]  }
  0xe4   : > { %1910 = vmatprep.mubr.bf16.mxu0 %v581_v16  ;;  %1658 = vmatpush1.bf16.msra.mxu1 %v3159_v17  ;;  %v400_v15 = vld [vmem:[%s3778_s30 + $0x380] sm:$0xff]  ;;  %v465_v3 = vld [vmem:[%s3778_s30 + $0x588] sm:$0xff] }
  0xe5   : > { %2044 = vmatpush1.bf16.msra.mxu0 %v3162_v18  ;;  %1659 = vmatprep.subr.bf16.mxu1 %v3167_v22  ;;  %v408_v16 = vld [vmem:[%s3778_s30 + $0x3c0] sm:$0xff]  ;;  %v3203_v22 = vld [vmem:[#allocation6 + $0x1d4] ss:$8 sps:$4 sm:$0xff]   ;;  %v473_v4 = vld [vmem:[%s3778_s30 + $0x5c8] sm:$0xff] }
  0xe6   : > { %2045 = vmatprep.subr.bf16.mxu0 %v3170_v23  ;;  %v404_v17 = vld [vmem:[%s3778_s30 + $0x3a0] sm:$0xff]  ;;  %v429_v23 = vld [vmem:[%s3778_s30 + $0x468] sm:$0xff]  ;;  %v600_v27 = vpack.c.bf16 %v408_v16, %v400_v15 }
  0xe7   : > { %v412_v18 = vld [vmem:[%s3778_s30 + $0x3e0] sm:$0xff]  ;;  %v481_v15 = vld [vmem:[%s3778_s30 + $0x608] sm:$0xff] }
  0xe8   : > { %1660 = vmatpush1.bf16.msra.mxu1 %v3165_v29  ;;  %v604_v28 = vpack.c.bf16 %v412_v18, %v404_v17  ;;  %v609_v29 = vpack.c.bf16 %v425_v20, %v417_v19  ;;  %v452_v1 = vld [vmem:[%s3778_s30 + $0x520] sm:$0xff]  ;;  %v489_v16 = vld [vmem:[%s3778_s30 + $0x648] sm:$0xff] }
  0xe9   : > { %2046 = vmatpush1.bf16.msra.mxu0 %v3168_v30  ;;  %1661 = vmatprep.subr.bf16.mxu1 %v3173_v31  ;;  %v613_v30 = vpack.c.bf16 %v429_v23, %v421_v21  ;;  %v3209_v31 = vld [vmem:[#allocation6 + $0x1e4] ss:$8 sps:$4 sm:$0xff]   ;;  %v641_v21 = vpack.c.bf16 %v489_v16, %v481_v15 }
  0xea   : > { %2047 = vmatprep.subr.bf16.mxu0 %v3176_v32  ;;  %1525 = vmatmul.mubr.bf16.gmra.mrb[16].mxu1 %v576_v33  ;;  %v3207_v32 = vld [vmem:[#allocation6 + $0x1e0] ss:$8 sps:$4 sm:$0xff]  }
  0xeb   : > { %1911 = vmatmul.mubr.bf16.gmra.mrb[16].mxu0 %v580_v34  ;;  %1534 = vmatprep.mubr.bf16.mxu1 %v585_v35  ;;  %v416_v33 = vld [vmem:[%s3778_s30 + $0x400] sm:$0xff]  ;;  %v485_v17 = vld [vmem:[%s3778_s30 + $0x628] sm:$0xff] }
  0xec   : > { %1920 = vmatprep.mubr.bf16.mxu0 %v589_v36  ;;  %1662 = vmatpush1.bf16.msra.mxu1 %v3171_v37  ;;  %v424_v34 = vld [vmem:[%s3778_s30 + $0x440] sm:$0xff]  ;;  %v493_v18 = vld [vmem:[%s3778_s30 + $0x668] sm:$0xff] }
  0xed   : > { %2048 = vmatpush1.bf16.msra.mxu0 %v3174_v38  ;;  %1663 = vmatprep.subr.bf16.mxu1 %v3179_v39  ;;  %v420_v35 = vld [vmem:[%s3778_s30 + $0x420] sm:$0xff]  ;;  %v433_v39 = vld [vmem:[%s3778_s30 + $0x488] sm:$0xff]  ;;  %v608_v45 = vpack.c.bf16 %v424_v34, %v416_v33 }
  0xee   : > { %2049 = vmatprep.subr.bf16.mxu0 %v3182_v43  ;;  %v3210_v36 = vld [vmem:[#allocation6 + $0x3e0] ss:$8 sps:$4 sm:$0xff]   ;;  %v3212_v37 = vld [vmem:[#allocation6 + $0x3e4] ss:$8 sps:$4 sm:$0xff]   ;;  %v3213_v43 = vld [vmem:[#allocation6 + $0x1f0] ss:$8 sps:$4 sm:$0xff]  }
  0xef   : > { %v428_v38 = vld [vmem:[%s3778_s30 + $0x460] sm:$0xff] }
  0xf0   : > { %1664 = vmatpush1.bf16.msra.mxu1 %v3177_v49  ;;  %v612_v46 = vpack.c.bf16 %v428_v38, %v420_v35  ;;  %v617_v49 = vpack.c.bf16 %v441_v40, %v433_v39  ;;  %v460_v2 = vld [vmem:[%s3778_s30 + $0x560] sm:$0xff]  ;;  %v513_v39 = vld [vmem:[%s3778_s30 + $0x708] sm:$0xff] }
  0xf1   : > { %2050 = vmatpush1.bf16.msra.mxu0 %v3180_v50  ;;  %1665 = vmatprep.subr.bf16.mxu1 %v3185_v51  ;;  %v621_v50 = vpack.c.bf16 %v445_v42, %v437_v41  ;;  %v432_v51 = vld [vmem:[%s3778_s30 + $0x480] sm:$0xff]  ;;  %v521_v40 = vld [vmem:[%s3778_s30 + $0x748] sm:$0xff] }
  0xf2   : > { %2051 = vmatprep.subr.bf16.mxu0 %v3188_v52  ;;  %1535 = vmatmul.mubr.bf16.gmra.mrb[20].mxu1 %v584_v53  ;;  %v440_v52 = vld [vmem:[%s3778_s30 + $0x4c0] sm:$0xff]  ;;  %v517_v41 = vld [vmem:[%s3778_s30 + $0x728] sm:$0xff] }
  0xf3   : > { %1921 = vmatmul.mubr.bf16.gmra.mrb[20].mxu0 %v588_v54  ;;  %1544 = vmatprep.mubr.bf16.mxu1 %v593_v55  ;;  %v436_v53 = vld [vmem:[%s3778_s30 + $0x4a0] sm:$0xff]  ;;  %v449_v55 = vld [vmem:[%s3778_s30 + $0x508] sm:$0xff]  ;;  %v616_v59 = vpack.c.bf16 %v440_v52, %v432_v51 }
  0xf4   : > { %1930 = vmatprep.mubr.bf16.mxu0 %v597_v56  ;;  %1666 = vmatpush1.bf16.msra.mxu1 %v3183_v57  ;;  %v444_v54 = vld [vmem:[%s3778_s30 + $0x4e0] sm:$0xff]  ;;  %v457_v56 = vld [vmem:[%s3778_s30 + $0x548] sm:$0xff] }
  0xf5   : > { %2052 = vmatpush1.bf16.msra.mxu0 %v3186_v58  ;;  %1667 = vmatprep.subr.bf16.mxu1 %v3191_v62  ;;  %v453_v57 = vld [vmem:[%s3778_s30 + $0x528] sm:$0xff]  ;;  %v620_v60 = vpack.c.bf16 %v444_v54, %v436_v53  ;;  %v625_v61 = vpack.c.bf16 %v457_v56, %v449_v55  ;;  %v480_v23 = vld [vmem:[%s3778_s30 + $0x600] sm:$0xff] }
  0xf6   : > { %2053 = vmatprep.subr.bf16.mxu0 %v3194_v63  ;;  %v461_v58 = vld [vmem:[%s3778_s30 + $0x568] sm:$0xff]  ;;  %v448_v63 = vld [vmem:[%s3778_s30 + $0x500] sm:$0xff] }
  0xf7   : > { %v629_v62 = vpack.c.bf16 %v461_v58, %v453_v57  ;;  %v496_v35 = vld [vmem:[%s3778_s30 + $0x680] sm:$0xff]  ;;  %v525_v42 = vld [vmem:[%s3778_s30 + $0x768] sm:$0xff] }
  0xf8   : > { %1668 = vmatpush1.bf16.msra.mxu1 %v3189_v5  ;;  %v469_v5 = vld [vmem:[%s3778_s30 + $0x5a8] sm:$0xff]  ;;  %v508_v38 = vld [vmem:[%s3778_s30 + $0x6e0] sm:$0xff] }
  0xf9   : > { %2054 = vmatpush1.bf16.msra.mxu0 %v3192_v6  ;;  %1669 = vmatprep.subr.bf16.mxu1 %v3197_v7  ;;  %v477_v6 = vld [vmem:[%s3778_s30 + $0x5e8] sm:$0xff]  ;;  %v624_v7 = vpack.c.bf16 %v456_v0, %v448_v63  ;;  %v291_v63 = vld [vmem:[%s3778_s30 + $0x18] sm:$0xff] }
  0xfa   : > { %2055 = vmatprep.subr.bf16.mxu0 %v3200_v10  ;;  %1545 = vmatmul.mubr.bf16.gmra.mrb[24].mxu1 %v592_v8  ;;  %v628_v8 = vpack.c.bf16 %v460_v2, %v452_v1  ;;  %v637_v10 = vpack.c.bf16 %v477_v6, %v469_v5  ;;  %v529_v51 = vld [vmem:[%s3778_s30 + $0x788] sm:$0xff]  ;;  %v299_v0 = vld [vmem:[%s3778_s30 + $0x58] sm:$0xff] }
  0xfb   : > { %1931 = vmatmul.mubr.bf16.gmra.mrb[24].mxu0 %v596_v9  ;;  %1554 = vmatprep.mubr.bf16.mxu1 %v601_v11  ;;  %v633_v9 = vpack.c.bf16 %v473_v4, %v465_v3  ;;  %v464_v11 = vld [vmem:[%s3778_s30 + $0x580] sm:$0xff]  ;;  %v537_v52 = vld [vmem:[%s3778_s30 + $0x7c8] sm:$0xff]  ;;  %v295_v1 = vld [vmem:[%s3778_s30 + $0x38] sm:$0xff]  ;;  %v547_v5 = vpack.c.bf16 %v299_v0, %v291_v63 }
  0xfc   : > { %1940 = vmatprep.mubr.bf16.mxu0 %v605_v12  ;;  %1670 = vmatpush1.bf16.msra.mxu1 %v3195_v13  ;;  %v472_v12 = vld [vmem:[%s3778_s30 + $0x5c0] sm:$0xff]  ;;  %v533_v53 = vld [vmem:[%s3778_s30 + $0x7a8] sm:$0xff]  ;;  %v665_v57 = vpack.c.bf16 %v537_v52, %v529_v51  ;;  %v303_v2 = vld [vmem:[%s3778_s30 + $0x78] sm:$0xff] }
  0xfd   : > { %2056 = vmatpush1.bf16.msra.mxu0 %v3198_v14  ;;  %1671 = vmatprep.subr.bf16.mxu1 %v3203_v22  ;;  %v468_v13 = vld [vmem:[%s3778_s30 + $0x5a0] sm:$0xff]  ;;  %v632_v19 = vpack.c.bf16 %v472_v12, %v464_v11  ;;  %v645_v22 = vpack.c.bf16 %v493_v18, %v485_v17  ;;  %v541_v54 = vld [vmem:[%s3778_s30 + $0x7e8] sm:$0xff]  ;;  %v551_v6 = vpack.c.bf16 %v303_v2, %v295_v1  ;;  %v307_v11 = vld [vmem:[%s3778_s30 + $0x98] sm:$0xff] }
  0xfe   : > { %2057 = vmatprep.subr.bf16.mxu0 %v3206_v26  ;;  %v476_v14 = vld [vmem:[%s3778_s30 + $0x5e0] sm:$0xff]  ;;  %v669_v58 = vpack.c.bf16 %v541_v54, %v533_v53  ;;  %v315_v12 = vld [vmem:[%s3778_s30 + $0xd8] sm:$0xff] }
  0xff   : > { %v636_v20 = vpack.c.bf16 %v476_v14, %v468_v13  ;;  %v492_v26 = vld [vmem:[%s3778_s30 + $0x660] sm:$0xff]  ;;  %v311_v13 = vld [vmem:[%s3778_s30 + $0xb8] sm:$0xff]  ;;  %v555_v17 = vpack.c.bf16 %v315_v12, %v307_v11 }
 0x100   : > { %1672 = vmatpush1.bf16.msra.mxu1 %v3201_v24  ;;  %v488_v24 = vld [vmem:[%s3778_s30 + $0x640] sm:$0xff]  ;;  %v319_v14 = vld [vmem:[%s3778_s30 + $0xf8] sm:$0xff] }
 0x101   : > { %2058 = vmatpush1.bf16.msra.mxu0 %v3204_v25  ;;  %1673 = vmatprep.subr.bf16.mxu1 %v3209_v31  ;;  %v484_v25 = vld [vmem:[%s3778_s30 + $0x620] sm:$0xff]  ;;  %v640_v31 = vpack.c.bf16 %v488_v24, %v480_v23  ;;  %v559_v18 = vpack.c.bf16 %v319_v14, %v311_v13  ;;  %v323_v23 = vld [vmem:[%s3778_s30 + $0x118] sm:$0xff] }
 0x102   : > { %1555 = vmatmul.mubr.bf16.gmra.mrb[28].mxu1 %v600_v27  ;;  %2059 = vmatprep.subr.bf16.mxu0 %v3212_v37  ;;  %v497_v27 = vld [vmem:[%s3778_s30 + $0x688] sm:$0xff]  ;;  %v500_v37 = vld [vmem:[%s3778_s30 + $0x6a0] sm:$0xff]  ;;  %v331_v24 = vld [vmem:[%s3778_s30 + $0x158] sm:$0xff] }
 0x103   : > { %1941 = vmatmul.mubr.bf16.gmra.mrb[28].mxu0 %v604_v28  ;;  %1564 = vmatprep.mubr.bf16.mxu1 %v609_v29  ;;  %v505_v28 = vld [vmem:[%s3778_s30 + $0x6c8] sm:$0xff] }
 0x104   : > { %1950 = vmatprep.mubr.bf16.mxu0 %v613_v30  ;;  %1674 = vmatpush1.bf16.msra.mxu1 %v3207_v32  ;;  %v501_v29 = vld [vmem:[%s3778_s30 + $0x6a8] sm:$0xff]  ;;  %v644_v32 = vpack.c.bf16 %v492_v26, %v484_v25  ;;  %v649_v33 = vpack.c.bf16 %v505_v28, %v497_v27  ;;  %v327_v25 = vld [vmem:[%s3778_s30 + $0x138] sm:$0xff] }
 0x105   : > { %2060 = vmatpush1.bf16.msra.mxu0 %v3210_v36  ;;  %1675 = vmatprep.subr.bf16.mxu1 %v3215_v44  ;;  %v509_v30 = vld [vmem:[%s3778_s30 + $0x6e8] sm:$0xff]  ;;  %v504_v36 = vld [vmem:[%s3778_s30 + $0x6c0] sm:$0xff]  ;;  %v652_v44 = vpack.c.bf16 %v508_v38, %v500_v37  ;;  %v335_v26 = vld [vmem:[%s3778_s30 + $0x178] sm:$0xff] }
 0x106   : > { %2061 = vmatprep.subr.bf16.mxu0 %v3218_v48  ;;  %v653_v34 = vpack.c.bf16 %v509_v30, %v501_v29  ;;  %v520_v48 = vld [vmem:[%s3778_s30 + $0x740] sm:$0xff]  ;;  %v563_v29 = vpack.c.bf16 %v331_v24, %v323_v23  ;;  %v567_v30 = vpack.c.bf16 %v335_v26, %v327_v25  ;;  %v343_v37 = vld [vmem:[%s3778_s30 + $0x1b8] sm:$0xff] }
 0x107   : > { %v351_v38 = vld [vmem:[%s3778_s30 + $0x1f8] sm:$0xff] }
 0x108   : > { %1676 = vmatpush1.bf16.msra.mxu1 %v3213_v43  ;;  %v648_v43 = vpack.c.bf16 %v504_v36, %v496_v35  ;;  %v339_v35 = vld [vmem:[%s3778_s30 + $0x198] sm:$0xff] }
 0x109   : > { %2062 = vmatpush1.bf16.msra.mxu0 %v3216_v47  ;;  %v512_v47 = vld [vmem:[%s3778_s30 + $0x700] sm:$0xff]  ;;  %v347_v36 = vld [vmem:[%s3778_s30 + $0x1d8] sm:$0xff] }
 0x10a   : > { %1565 = vmatmul.mubr.bf16.gmra.mrb[32].mxu1 %v608_v45  ;;  %v657_v45 = vpack.c.bf16 %v521_v40, %v513_v39  ;;  %v656_v55 = vpack.c.bf16 %v520_v48, %v512_v47  ;;  %v355_v47 = vld [vmem:[%s3778_s30 + $0x218] sm:$0xff] }
 0x10b   : > { %1951 = vmatmul.mubr.bf16.gmra.mrb[32].mxu0 %v612_v46  ;;  %1574 = vmatprep.mubr.bf16.mxu1 %v617_v49  ;;  %v661_v46 = vpack.c.bf16 %v525_v42, %v517_v41  ;;  %v516_v49 = vld [vmem:[%s3778_s30 + $0x720] sm:$0xff]  ;;  %v571_v41 = vpack.c.bf16 %v347_v36, %v339_v35  ;;  %v575_v42 = vpack.c.bf16 %v351_v38, %v343_v37  ;;  %v363_v48 = vld [vmem:[%s3778_s30 + $0x258] sm:$0xff] }
 0x10c   : > { %1960 = vmatprep.mubr.bf16.mxu0 %v621_v50  ;;  %v524_v50 = vld [vmem:[%s3778_s30 + $0x760] sm:$0xff]  ;;  %v579_v53 = vpack.c.bf16 %v363_v48, %v355_v47 }
 0x10d   : > { %v660_v56 = vpack.c.bf16 %v524_v50, %v516_v49  ;;  %v359_v49 = vld [vmem:[%s3778_s30 + $0x238] sm:$0xff] }
 0x10e   : > { %v367_v50 = vld [vmem:[%s3778_s30 + $0x278] sm:$0xff] }
 0x10f   : > { %v583_v54 = vpack.c.bf16 %v367_v50, %v359_v49 }
 0x112   : > { %1575 = vmatmul.mubr.bf16.gmra.mrb[36].mxu1 %v616_v59  ;;  %v528_v59 = vld [vmem:[%s3778_s30 + $0x780] sm:$0xff] }
 0x113   : > { %1961 = vmatmul.mubr.bf16.gmra.mrb[36].mxu0 %v620_v60  ;;  %1584 = vmatprep.mubr.bf16.mxu1 %v625_v61  ;;  %v536_v60 = vld [vmem:[%s3778_s30 + $0x7c0] sm:$0xff] }
 0x114   : > { %1970 = vmatprep.mubr.bf16.mxu0 %v629_v62  ;;  %v532_v61 = vld [vmem:[%s3778_s30 + $0x7a0] sm:$0xff]  ;;  %v664_v3 = vpack.c.bf16 %v536_v60, %v528_v59  ;;  %v371_v59 = vld [vmem:[%s3778_s30 + $0x298] sm:$0xff] }
 0x115   : > { %v540_v62 = vld [vmem:[%s3778_s30 + $0x7e0] sm:$0xff]  ;;  %v379_v60 = vld [vmem:[%s3778_s30 + $0x2d8] sm:$0xff] }
 0x116   : > { %v668_v4 = vpack.c.bf16 %v540_v62, %v532_v61  ;;  %v375_v61 = vld [vmem:[%s3778_s30 + $0x2b8] sm:$0xff]  ;;  %v587_v1 = vpack.c.bf16 %v379_v60, %v371_v59 }
 0x117   : > { %v383_v62 = vld [vmem:[%s3778_s30 + $0x2f8] sm:$0xff] }
 0x118   : > { %v591_v2 = vpack.c.bf16 %v383_v62, %v375_v61 }
 0x11a   : > { %1585 = vmatmul.mubr.bf16.gmra.mrb[40].mxu1 %v624_v7  ;;  %v290_v7 = vld [vmem:[%s3778_s30 + $0x10] sm:$0xff] }
 0x11b   : > { %1971 = vmatmul.mubr.bf16.gmra.mrb[40].mxu0 %v628_v8  ;;  %1594 = vmatprep.mubr.bf16.mxu1 %v633_v9  ;;  %v298_v8 = vld [vmem:[%s3778_s30 + $0x50] sm:$0xff] }
 0x11c   : > { %1980 = vmatprep.mubr.bf16.mxu0 %v637_v10  ;;  %v294_v9 = vld [vmem:[%s3778_s30 + $0x30] sm:$0xff]  ;;  %v546_v15 = vpack.c.bf16 %v298_v8, %v290_v7  ;;  %v387_v7 = vld [vmem:[%s3778_s30 + $0x318] sm:$0xff] }
 0x11d   : > { %v302_v10 = vld [vmem:[%s3778_s30 + $0x70] sm:$0xff]  ;;  %v395_v8 = vld [vmem:[%s3778_s30 + $0x358] sm:$0xff] }
 0x11e   : > { %v550_v16 = vpack.c.bf16 %v302_v10, %v294_v9  ;;  %v391_v9 = vld [vmem:[%s3778_s30 + $0x338] sm:$0xff]  ;;  %v595_v13 = vpack.c.bf16 %v395_v8, %v387_v7 }
 0x11f   : > { %v399_v10 = vld [vmem:[%s3778_s30 + $0x378] sm:$0xff] }
 0x120   : > { %v599_v14 = vpack.c.bf16 %v399_v10, %v391_v9 }
 0x122   : > { %1595 = vmatmul.mubr.bf16.gmra.mrb[44].mxu1 %v632_v19  ;;  %v306_v19 = vld [vmem:[%s3778_s30 + $0x90] sm:$0xff] }
 0x123   : > { %1981 = vmatmul.mubr.bf16.gmra.mrb[44].mxu0 %v636_v20  ;;  %1604 = vmatprep.mubr.bf16.mxu1 %v641_v21  ;;  %v314_v20 = vld [vmem:[%s3778_s30 + $0xd0] sm:$0xff] }
 0x124   : > { %1990 = vmatprep.mubr.bf16.mxu0 %v645_v22  ;;  %v310_v21 = vld [vmem:[%s3778_s30 + $0xb0] sm:$0xff]  ;;  %v554_v27 = vpack.c.bf16 %v314_v20, %v306_v19  ;;  %v403_v19 = vld [vmem:[%s3778_s30 + $0x398] sm:$0xff] }
 0x125   : > { %v318_v22 = vld [vmem:[%s3778_s30 + $0xf0] sm:$0xff]  ;;  %v411_v20 = vld [vmem:[%s3778_s30 + $0x3d8] sm:$0xff] }
 0x126   : > { %v558_v28 = vpack.c.bf16 %v318_v22, %v310_v21  ;;  %v407_v21 = vld [vmem:[%s3778_s30 + $0x3b8] sm:$0xff]  ;;  %v603_v25 = vpack.c.bf16 %v411_v20, %v403_v19 }
 0x127   : > { %v415_v22 = vld [vmem:[%s3778_s30 + $0x3f8] sm:$0xff] }
 0x128   : > { %v607_v26 = vpack.c.bf16 %v415_v22, %v407_v21 }
 0x12a   : > { %1605 = vmatmul.mubr.bf16.gmra.mrb[48].mxu1 %v640_v31  ;;  %v322_v31 = vld [vmem:[%s3778_s30 + $0x110] sm:$0xff] }
 0x12b   : > { %1991 = vmatmul.mubr.bf16.gmra.mrb[48].mxu0 %v644_v32  ;;  %1614 = vmatprep.mubr.bf16.mxu1 %v649_v33  ;;  %v330_v32 = vld [vmem:[%s3778_s30 + $0x150] sm:$0xff] }
 0x12c   : > { %2000 = vmatprep.mubr.bf16.mxu0 %v653_v34  ;;  %v326_v33 = vld [vmem:[%s3778_s30 + $0x130] sm:$0xff]  ;;  %v562_v39 = vpack.c.bf16 %v330_v32, %v322_v31  ;;  %v419_v31 = vld [vmem:[%s3778_s30 + $0x418] sm:$0xff] }
 0x12d   : > { %v334_v34 = vld [vmem:[%s3778_s30 + $0x170] sm:$0xff]  ;;  %v427_v32 = vld [vmem:[%s3778_s30 + $0x458] sm:$0xff] }
 0x12e   : > { %v566_v40 = vpack.c.bf16 %v334_v34, %v326_v33  ;;  %v423_v33 = vld [vmem:[%s3778_s30 + $0x438] sm:$0xff]  ;;  %v611_v37 = vpack.c.bf16 %v427_v32, %v419_v31 }
 0x12f   : > { %v431_v34 = vld [vmem:[%s3778_s30 + $0x478] sm:$0xff] }
 0x130   : > { %v615_v38 = vpack.c.bf16 %v431_v34, %v423_v33 }
 0x132   : > { %1615 = vmatmul.mubr.bf16.gmra.mrb[52].mxu1 %v648_v43  ;;  %v338_v43 = vld [vmem:[%s3778_s30 + $0x190] sm:$0xff] }
 0x133   : > { %2001 = vmatmul.mubr.bf16.gmra.mrb[52].mxu0 %v652_v44  ;;  %1624 = vmatprep.mubr.bf16.mxu1 %v657_v45  ;;  %v346_v44 = vld [vmem:[%s3778_s30 + $0x1d0] sm:$0xff] }
 0x134   : > { %2010 = vmatprep.mubr.bf16.mxu0 %v661_v46  ;;  %v342_v45 = vld [vmem:[%s3778_s30 + $0x1b0] sm:$0xff]  ;;  %v570_v51 = vpack.c.bf16 %v346_v44, %v338_v43  ;;  %v435_v43 = vld [vmem:[%s3778_s30 + $0x498] sm:$0xff] }
 0x135   : > { %v350_v46 = vld [vmem:[%s3778_s30 + $0x1f0] sm:$0xff]  ;;  %v443_v44 = vld [vmem:[%s3778_s30 + $0x4d8] sm:$0xff] }
 0x136   : > { %v574_v52 = vpack.c.bf16 %v350_v46, %v342_v45  ;;  %v439_v45 = vld [vmem:[%s3778_s30 + $0x4b8] sm:$0xff]  ;;  %v619_v49 = vpack.c.bf16 %v443_v44, %v435_v43 }
 0x137   : > { %v447_v46 = vld [vmem:[%s3778_s30 + $0x4f8] sm:$0xff] }
 0x138   : > { %v623_v50 = vpack.c.bf16 %v447_v46, %v439_v45 }
 0x13a   : > { %1625 = vmatmul.mubr.bf16.gmra.mrb[56].mxu1 %v656_v55  ;;  %v354_v55 = vld [vmem:[%s3778_s30 + $0x210] sm:$0xff] }
 0x13b   : > { %2011 = vmatmul.mubr.bf16.gmra.mrb[56].mxu0 %v660_v56  ;;  %1634 = vmatprep.mubr.bf16.mxu1 %v665_v57  ;;  %v362_v56 = vld [vmem:[%s3778_s30 + $0x250] sm:$0xff] }
 0x13c   : > { %2020 = vmatprep.mubr.bf16.mxu0 %v669_v58  ;;  %v358_v57 = vld [vmem:[%s3778_s30 + $0x230] sm:$0xff]  ;;  %v578_v63 = vpack.c.bf16 %v362_v56, %v354_v55  ;;  %v451_v55 = vld [vmem:[%s3778_s30 + $0x518] sm:$0xff] }
 0x13d   : > { %v366_v58 = vld [vmem:[%s3778_s30 + $0x270] sm:$0xff]  ;;  %v459_v56 = vld [vmem:[%s3778_s30 + $0x558] sm:$0xff] }
 0x13e   : > { %v582_v0 = vpack.c.bf16 %v366_v58, %v358_v57  ;;  %v455_v57 = vld [vmem:[%s3778_s30 + $0x538] sm:$0xff]  ;;  %v627_v61 = vpack.c.bf16 %v459_v56, %v451_v55 }
 0x13f   : > { %v463_v58 = vld [vmem:[%s3778_s30 + $0x578] sm:$0xff] }
 0x140   : > { %v631_v62 = vpack.c.bf16 %v463_v58, %v455_v57 }
 0x142   : > { %1635 = vmatmul.mubr.bf16.gmra.mrb[60].mxu1 %v664_v3  ;;  %v370_v3 = vld [vmem:[%s3778_s30 + $0x290] sm:$0xff] }
 0x143   : > { %2021 = vmatmul.mubr.bf16.gmra.mrb[60].mxu0 %v668_v4  ;;  %1677 = vmatprep.mubr.bf16.mxu1 %v547_v5  ;;  %v378_v4 = vld [vmem:[%s3778_s30 + $0x2d0] sm:$0xff] }
 0x144   : > { %2063 = vmatprep.mubr.bf16.mxu0 %v551_v6  ;;  %v374_v5 = vld [vmem:[%s3778_s30 + $0x2b0] sm:$0xff]  ;;  %v586_v11 = vpack.c.bf16 %v378_v4, %v370_v3  ;;  %v467_v3 = vld [vmem:[%s3778_s30 + $0x598] sm:$0xff] }
 0x145   : > { %v382_v6 = vld [vmem:[%s3778_s30 + $0x2f0] sm:$0xff]  ;;  %v475_v4 = vld [vmem:[%s3778_s30 + $0x5d8] sm:$0xff] }
 0x146   : > { %v590_v12 = vpack.c.bf16 %v382_v6, %v374_v5  ;;  %v471_v5 = vld [vmem:[%s3778_s30 + $0x5b8] sm:$0xff]  ;;  %v635_v9 = vpack.c.bf16 %v475_v4, %v467_v3  ;;  %v800_v4 = vld [vmem:[#allocation8] sm:$0x3] }
 0x147   : > { %v479_v6 = vld [vmem:[%s3778_s30 + $0x5f8] sm:$0xff] }
 0x148   : > { %v639_v10 = vpack.c.bf16 %v479_v6, %v471_v5 }
 0x14a   : > { %1678 = vmatmul.mubr.bf16.vlgmr.msra.gmra.mrb[0].mxu1 %v546_v15  ;;  %v386_v15 = vld [vmem:[%s3778_s30 + $0x310] sm:$0xff] }
 0x14b   : > { %2064 = vmatmul.mubr.bf16.vlgmr.msra.gmra.mrb[0].mxu0 %v550_v16  ;;  %1687 = vmatprep.mubr.bf16.mxu1 %v555_v17  ;;  %v394_v16 = vld [vmem:[%s3778_s30 + $0x350] sm:$0xff] }
 0x14c   : > { %2073 = vmatprep.mubr.bf16.mxu0 %v559_v18  ;;  %v390_v17 = vld [vmem:[%s3778_s30 + $0x330] sm:$0xff]  ;;  %v594_v23 = vpack.c.bf16 %v394_v16, %v386_v15  ;;  %v483_v15 = vld [vmem:[%s3778_s30 + $0x618] sm:$0xff] }
 0x14d   : > { %v398_v18 = vld [vmem:[%s3778_s30 + $0x370] sm:$0xff]  ;;  %v491_v16 = vld [vmem:[%s3778_s30 + $0x658] sm:$0xff] }
 0x14e   : > { %v598_v24 = vpack.c.bf16 %v398_v18, %v390_v17  ;;  %v487_v17 = vld [vmem:[%s3778_s30 + $0x638] sm:$0xff]  ;;  %v643_v21 = vpack.c.bf16 %v491_v16, %v483_v15 }
 0x14f   : > { %v495_v18 = vld [vmem:[%s3778_s30 + $0x678] sm:$0xff] }
 0x150   : > { %v647_v22 = vpack.c.bf16 %v495_v18, %v487_v17 }
 0x152   : > { %1688 = vmatmul.mubr.bf16.gmra.mrb[4].mxu1 %v554_v27  ;;  %v402_v27 = vld [vmem:[%s3778_s30 + $0x390] sm:$0xff] }
 0x153   : > { %2074 = vmatmul.mubr.bf16.gmra.mrb[4].mxu0 %v558_v28  ;;  %1697 = vmatprep.mubr.bf16.mxu1 %v563_v29  ;;  %v410_v28 = vld [vmem:[%s3778_s30 + $0x3d0] sm:$0xff] }
 0x154   : > { %2083 = vmatprep.mubr.bf16.mxu0 %v567_v30  ;;  %v406_v29 = vld [vmem:[%s3778_s30 + $0x3b0] sm:$0xff]  ;;  %v602_v35 = vpack.c.bf16 %v410_v28, %v402_v27  ;;  %v499_v27 = vld [vmem:[%s3778_s30 + $0x698] sm:$0xff] }
 0x155   : > { %v414_v30 = vld [vmem:[%s3778_s30 + $0x3f0] sm:$0xff]  ;;  %v507_v28 = vld [vmem:[%s3778_s30 + $0x6d8] sm:$0xff] }
 0x156   : > { %v606_v36 = vpack.c.bf16 %v414_v30, %v406_v29  ;;  %v503_v29 = vld [vmem:[%s3778_s30 + $0x6b8] sm:$0xff]  ;;  %v651_v33 = vpack.c.bf16 %v507_v28, %v499_v27 }
 0x157   : > { %v511_v30 = vld [vmem:[%s3778_s30 + $0x6f8] sm:$0xff] }
 0x158   : > { %v655_v34 = vpack.c.bf16 %v511_v30, %v503_v29 }
 0x15a   : > { %1698 = vmatmul.mubr.bf16.gmra.mrb[8].mxu1 %v562_v39  ;;  %v418_v39 = vld [vmem:[%s3778_s30 + $0x410] sm:$0xff] }
 0x15b   : > { %2084 = vmatmul.mubr.bf16.gmra.mrb[8].mxu0 %v566_v40  ;;  %1707 = vmatprep.mubr.bf16.mxu1 %v571_v41  ;;  %v426_v40 = vld [vmem:[%s3778_s30 + $0x450] sm:$0xff] }
 0x15c   : > { %2093 = vmatprep.mubr.bf16.mxu0 %v575_v42  ;;  %v422_v41 = vld [vmem:[%s3778_s30 + $0x430] sm:$0xff]  ;;  %v610_v47 = vpack.c.bf16 %v426_v40, %v418_v39  ;;  %v515_v39 = vld [vmem:[%s3778_s30 + $0x718] sm:$0xff] }
 0x15d   : > { %v430_v42 = vld [vmem:[%s3778_s30 + $0x470] sm:$0xff]  ;;  %v523_v40 = vld [vmem:[%s3778_s30 + $0x758] sm:$0xff] }
 0x15e   : > { %v614_v48 = vpack.c.bf16 %v430_v42, %v422_v41  ;;  %v519_v41 = vld [vmem:[%s3778_s30 + $0x738] sm:$0xff]  ;;  %v659_v45 = vpack.c.bf16 %v523_v40, %v515_v39 }
 0x15f   : > { %v527_v42 = vld [vmem:[%s3778_s30 + $0x778] sm:$0xff] }
 0x160   : > { %v663_v46 = vpack.c.bf16 %v527_v42, %v519_v41  ;;  %v4067_v42 = vld.sshfl [vmem:[#allocation9] sm:$0x11 pattern:$0x75316420] }
 0x162   : > { %1708 = vmatmul.mubr.bf16.gmra.mrb[12].mxu1 %v570_v51  ;;  %v434_v51 = vld [vmem:[%s3778_s30 + $0x490] sm:$0xff] }
 0x163   : > { %2094 = vmatmul.mubr.bf16.gmra.mrb[12].mxu0 %v574_v52  ;;  %1717 = vmatprep.mubr.bf16.mxu1 %v579_v53  ;;  %v442_v52 = vld [vmem:[%s3778_s30 + $0x4d0] sm:$0xff] }
 0x164   : > { %2103 = vmatprep.mubr.bf16.mxu0 %v583_v54  ;;  %v438_v53 = vld [vmem:[%s3778_s30 + $0x4b0] sm:$0xff]  ;;  %v618_v59 = vpack.c.bf16 %v442_v52, %v434_v51  ;;  %v531_v51 = vld [vmem:[%s3778_s30 + $0x798] sm:$0xff] }
 0x165   : > { %v446_v54 = vld [vmem:[%s3778_s30 + $0x4f0] sm:$0xff]  ;;  %v539_v52 = vld [vmem:[%s3778_s30 + $0x7d8] sm:$0xff] }
 0x166   : > { %v622_v60 = vpack.c.bf16 %v446_v54, %v438_v53  ;;  %v535_v53 = vld [vmem:[%s3778_s30 + $0x7b8] sm:$0xff]  ;;  %v667_v57 = vpack.c.bf16 %v539_v52, %v531_v51 }
 0x167   : > { %v543_v54 = vld [vmem:[%s3778_s30 + $0x7f8] sm:$0xff] }
 0x168   : > { %v671_v58 = vpack.c.bf16 %v543_v54, %v535_v53 }
 0x16a   : > { %1718 = vmatmul.mubr.bf16.gmra.mrb[16].mxu1 %v578_v63  ;;  %v450_v63 = vld [vmem:[%s3778_s30 + $0x510] sm:$0xff] }
 0x16b   : > { %2104 = vmatmul.mubr.bf16.gmra.mrb[16].mxu0 %v582_v0  ;;  %1727 = vmatprep.mubr.bf16.mxu1 %v587_v1  ;;  %v458_v0 = vld [vmem:[%s3778_s30 + $0x550] sm:$0xff] }
 0x16c   : > { %2113 = vmatprep.mubr.bf16.mxu0 %v591_v2  ;;  %v454_v1 = vld [vmem:[%s3778_s30 + $0x530] sm:$0xff]  ;;  %v626_v7 = vpack.c.bf16 %v458_v0, %v450_v63 }
 0x16d   : > { %v462_v2 = vld [vmem:[%s3778_s30 + $0x570] sm:$0xff] }
 0x16e   : > { %v630_v8 = vpack.c.bf16 %v462_v2, %v454_v1  ;;  %v802_v1 = vlaneseq }
 0x170   : > { %v4049_v2 = vshrl.u32 %v802_v1, 7  ;;  %vm2417_vm0 = vcmp.lt.s32.totalorder %v802_v1, 256 }
 0x172   : > { %1728 = vmatmul.mubr.bf16.gmra.mrb[20].mxu1 %v586_v11  ;;  %v466_v11 = vld [vmem:[%s3778_s30 + $0x590] sm:$0xff]  ;;  %v804_v3 = vsub.s32 0, %v4049_v2  ;;  %v808_v5 = vsub.s32 1, %v4049_v2 }
 0x173   : > { %2114 = vmatmul.mubr.bf16.gmra.mrb[20].mxu0 %v590_v12  ;;  %1737 = vmatprep.mubr.bf16.mxu1 %v595_v13  ;;  %v474_v12 = vld [vmem:[%s3778_s30 + $0x5d0] sm:$0xff] }
 0x174   : > { %2123 = vmatprep.mubr.bf16.mxu0 %v599_v14  ;;  %v470_v13 = vld [vmem:[%s3778_s30 + $0x5b0] sm:$0xff]  ;;  %v634_v19 = vpack.c.bf16 %v474_v12, %v466_v11  ;;  %v4055_v6 = vrot.slane %v800_v4, %v804_v3 }
 0x175   : > { %v478_v14 = vld [vmem:[%s3778_s30 + $0x5f0] sm:$0xff] }
 0x176   : > { %v638_v20 = vpack.c.bf16 %v478_v14, %v470_v13 }
 0x17a   : > { %1738 = vmatmul.mubr.bf16.gmra.mrb[24].mxu1 %v594_v23  ;;  %v482_v23 = vld [vmem:[%s3778_s30 + $0x610] sm:$0xff] }
 0x17b   : > { %2124 = vmatmul.mubr.bf16.gmra.mrb[24].mxu0 %v598_v24  ;;  %1747 = vmatprep.mubr.bf16.mxu1 %v603_v25  ;;  %v490_v24 = vld [vmem:[%s3778_s30 + $0x650] sm:$0xff] }
 0x17c   : > { %2133 = vmatprep.mubr.bf16.mxu0 %v607_v26  ;;  %v486_v25 = vld [vmem:[%s3778_s30 + $0x630] sm:$0xff]  ;;  %v642_v31 = vpack.c.bf16 %v490_v24, %v482_v23 }
 0x17d   : > { %v494_v26 = vld [vmem:[%s3778_s30 + $0x670] sm:$0xff] }
 0x17e   : > { %v646_v32 = vpack.c.bf16 %v494_v26, %v486_v25 }
 0x182   : > { %1748 = vmatmul.mubr.bf16.gmra.mrb[28].mxu1 %v602_v35  ;;  %v498_v35 = vld [vmem:[%s3778_s30 + $0x690] sm:$0xff] }
 0x183   : > { %2134 = vmatmul.mubr.bf16.gmra.mrb[28].mxu0 %v606_v36  ;;  %1757 = vmatprep.mubr.bf16.mxu1 %v611_v37  ;;  %v506_v36 = vld [vmem:[%s3778_s30 + $0x6d0] sm:$0xff] }
 0x184   : > { %2143 = vmatprep.mubr.bf16.mxu0 %v615_v38  ;;  %v502_v37 = vld [vmem:[%s3778_s30 + $0x6b0] sm:$0xff]  ;;  %v650_v43 = vpack.c.bf16 %v506_v36, %v498_v35 }
 0x185   : > { %v510_v38 = vld [vmem:[%s3778_s30 + $0x6f0] sm:$0xff] }
 0x186   : > { %v654_v44 = vpack.c.bf16 %v510_v38, %v502_v37  ;;  %v3545_v38 = vmov 1966171168  }
 0x187   : > { %v2341_v39 = vunpack.c.l.s4 %v3545_v38 }
 0x18a   : > { %1758 = vmatmul.mubr.bf16.gmra.mrb[32].mxu1 %v610_v47  ;;  %v514_v47 = vld [vmem:[%s3778_s30 + $0x710] sm:$0xff] }
 0x18b   : > { %2144 = vmatmul.mubr.bf16.gmra.mrb[32].mxu0 %v614_v48  ;;  %1767 = vmatprep.mubr.bf16.mxu1 %v619_v49  ;;  %v522_v48 = vld [vmem:[%s3778_s30 + $0x750] sm:$0xff] }
 0x18c   : > { %2153 = vmatprep.mubr.bf16.mxu0 %v623_v50  ;;  %v518_v49 = vld [vmem:[%s3778_s30 + $0x730] sm:$0xff]  ;;  %v658_v55 = vpack.c.bf16 %v522_v48, %v514_v47 }
 0x18d   : > { %v526_v50 = vld [vmem:[%s3778_s30 + $0x770] sm:$0xff] }
 0x18e   : > { %v662_v56 = vpack.c.bf16 %v526_v50, %v518_v49 }
 0x192   : > { %1768 = vmatmul.mubr.bf16.gmra.mrb[36].mxu1 %v618_v59  ;;  %v530_v59 = vld [vmem:[%s3778_s30 + $0x790] sm:$0xff] }
 0x193   : > { %2154 = vmatmul.mubr.bf16.gmra.mrb[36].mxu0 %v622_v60  ;;  %1777 = vmatprep.mubr.bf16.mxu1 %v627_v61  ;;  %v538_v60 = vld [vmem:[%s3778_s30 + $0x7d0] sm:$0xff] }
 0x194   : > { %2163 = vmatprep.mubr.bf16.mxu0 %v631_v62  ;;  %v534_v61 = vld [vmem:[%s3778_s30 + $0x7b0] sm:$0xff]  ;;  %v666_v63 = vpack.c.bf16 %v538_v60, %v530_v59 }
 0x195   : > { %v542_v62 = vld [vmem:[%s3778_s30 + $0x7f0] sm:$0xff] }
 0x196   : > { %v670_v0 = vpack.c.bf16 %v542_v62, %v534_v61 }
 0x19a   : > { %1778 = vmatmul.mubr.bf16.gmra.mrb[40].mxu1 %v626_v7  ;;  %v4057_v7 = vrot.slane %v800_v4, %v808_v5 }
 0x19b   : > { %2164 = vmatmul.mubr.bf16.gmra.mrb[40].mxu0 %v630_v8  ;;  %1787 = vmatprep.mubr.bf16.mxu1 %v635_v9 }
 0x19c   : > { %2173 = vmatprep.mubr.bf16.mxu0 %v639_v10 }
 0x1a2   : > { %1788 = vmatmul.mubr.bf16.gmra.mrb[44].mxu1 %v634_v19 }
 0x1a3   : > { %2174 = vmatmul.mubr.bf16.gmra.mrb[44].mxu0 %v638_v20  ;;  %1797 = vmatprep.mubr.bf16.mxu1 %v643_v21 }
 0x1a4   : > { %2183 = vmatprep.mubr.bf16.mxu0 %v647_v22 }
 0x1aa   : > { %1798 = vmatmul.mubr.bf16.gmra.mrb[48].mxu1 %v642_v31 }
 0x1ab   : > { %2184 = vmatmul.mubr.bf16.gmra.mrb[48].mxu0 %v646_v32  ;;  %1807 = vmatprep.mubr.bf16.mxu1 %v651_v33 }
 0x1ac   : > { %2193 = vmatprep.mubr.bf16.mxu0 %v655_v34 }
 0x1b2   : > { %1808 = vmatmul.mubr.bf16.gmra.mrb[52].mxu1 %v650_v43  ;;  %v2342_v43 = vunpack.c.0.s8 %v2341_v39 }
 0x1b3   : > { %2194 = vmatmul.mubr.bf16.gmra.mrb[52].mxu0 %v654_v44  ;;  %1817 = vmatprep.mubr.bf16.mxu1 %v659_v45  ;;  %v2339_v45 = vcombine.high %v4067_v42, %v4067_v42 }
 0x1b4   : > { %2203 = vmatprep.mubr.bf16.mxu0 %v663_v46  ;;  %v4072_v49 = vsub.s32 %v2342_v43, %v4049_v2 }
 0x1b6   : > { %v2353_v59 = vrot.slane %v2339_v45, %v4072_v49 }
 0x1ba   : > { %1818 = vmatmul.mubr.bf16.gmra.mrb[56].mxu1 %v658_v55 }
 0x1bb   : > { %2204 = vmatmul.mubr.bf16.gmra.mrb[56].mxu0 %v662_v56  ;;  %1827 = vmatprep.mubr.bf16.mxu1 %v667_v57 }
 0x1bc   : > { %2213 = vmatprep.mubr.bf16.mxu0 %v671_v58 }
 0x1c2   : > { %1828 = vmatmul.mubr.bf16.gmra.mrb[60].mxu1 %v666_v63 }
 0x1c3   : > { %2214 = vmatmul.mubr.bf16.gmra.mrb[60].mxu0 %v670_v0  ;;  %2388 = vmatprep.mubr.bf16.mxu1 %v2353_v59 }
 0x21d   : > { %v1679_v8 = vpop.f32.mrb[0].mxu1 }
 0x21e   : > { %v2065_v9 = vpop.f32.mrb[0].mxu0  ;;  %v2687_v10 = vadd.f32 %v1679_v8, %v4055_v6  ;;  %v1681_v11 = vpop.f32.mrb[1].mxu1 }
 0x21f   : > { %v2067_v12 = vpop.f32.mrb[1].mxu0  ;;  %v2689_v13 = vadd.f32 %v1681_v11, %v4057_v7  ;;  %v1683_v14 = vpop.f32.mrb[2].mxu1  ;;  %v3546_v11 = vmov 0  }
 0x220   : > { %v2069_v15 = vpop.f32.mrb[2].mxu0  ;;  %v2688_v16 = vadd.f32 %v2687_v10, %v2065_v9  ;;  %v2691_v17 = vadd.f32 %v1683_v14, %v4055_v6  ;;  %v1685_v18 = vpop.f32.mrb[3].mxu1  ;;  %v2321_v9 = vld [vmem:[#allocation2] sm:$0x1]  ;;  %3026 = vset.pattern.permute.xlu0 %v3546_v11 }
 0x221   : > { %v2071_v19 = vpop.f32.mrb[3].mxu0  ;;  %v2690_v20 = vadd.f32 %v2689_v13, %v2067_v12  ;;  %v2693_v21 = vadd.f32 %v1685_v18, %v4057_v7  ;;  %2324 = vperm.xlu0 %3026, %v2321_v9  }
 0x222   : > { %3219 = vtanh.f32 %v2688_v16  ;;  %v2692_v22 = vadd.f32 %v2691_v17, %v2069_v15 }
 0x223   : > { %3221 = vtanh.f32 %v2690_v20  ;;  %v2694_v23 = vadd.f32 %v2693_v21, %v2071_v19 }
 0x224   : > { %3223 = vtanh.f32 %v2692_v22 }
 0x225   : > { %3225 = vtanh.f32 %v2694_v23  ;;  %v1689_v24 = vpop.f32.mrb[4].mxu1 }
 0x226   : > { %v2075_v25 = vpop.f32.mrb[4].mxu0  ;;  %v2695_v26 = vadd.f32 %v1689_v24, %v4055_v6  ;;  %v1691_v27 = vpop.f32.mrb[5].mxu1 }
 0x227   : > { %v2077_v28 = vpop.f32.mrb[5].mxu0  ;;  %v2697_v29 = vadd.f32 %v1691_v27, %v4057_v7  ;;  %v1693_v30 = vpop.f32.mrb[6].mxu1 }
 0x228   : > { %v2079_v31 = vpop.f32.mrb[6].mxu0  ;;  %v2696_v32 = vadd.f32 %v2695_v26, %v2075_v25  ;;  %v2699_v33 = vadd.f32 %v1693_v30, %v4055_v6  ;;  %v1695_v34 = vpop.f32.mrb[7].mxu1 }
 0x229   : > { %v2081_v35 = vpop.f32.mrb[7].mxu0  ;;  %v2698_v36 = vadd.f32 %v2697_v29, %v2077_v28  ;;  %v2701_v37 = vadd.f32 %v1695_v34, %v4057_v7 }
 0x22a   : > { %3227 = vtanh.f32 %v2696_v32  ;;  %v2700_v40 = vadd.f32 %v2699_v33, %v2079_v31 }
 0x22b   : > { %3229 = vtanh.f32 %v2698_v36  ;;  %v2702_v41 = vadd.f32 %v2701_v37, %v2081_v35 }
 0x22c   : > { %v3220_v44 = vpop.eup %3219  ;;  %3231 = vtanh.f32 %v2700_v40 }
 0x22d   : > { %v3222_v46 = vpop.eup %3221  ;;  %3233 = vtanh.f32 %v2702_v41  ;;  %v1699_v47 = vpop.f32.mrb[8].mxu1 }
 0x22e   : > { %v2085_v48 = vpop.f32.mrb[8].mxu0  ;;  %v3224_v50 = vpop.eup %3223  ;;  %v2703_v51 = vadd.f32 %v1699_v47, %v4055_v6 }
 0x22f   : > { %v1701_v52 = vpop.f32.mrb[9].mxu1  ;;  %v2087_v53 = vpop.f32.mrb[9].mxu0  ;;  %v2289_v58 = vpack.c.bf16 %v3224_v50, %v3220_v44 }
 0x230   : > { %v3226_v54 = vpop.eup %3225  ;;  %v2705_v55 = vadd.f32 %v1701_v52, %v4057_v7  ;;  %v1703_v56 = vpop.f32.mrb[10].mxu1  ;;  %v2704_v60 = vadd.f32 %v2703_v51, %v2085_v48 }
 0x231   : > { %v2089_v57 = vpop.f32.mrb[10].mxu0  ;;  %v2707_v61 = vadd.f32 %v1703_v56, %v4055_v6  ;;  %v1705_v62 = vpop.f32.mrb[11].mxu1  ;;  %v2290_v0 = vpack.c.bf16 %v3226_v54, %v3222_v46 }
 0x232   : > { %v2091_v63 = vpop.f32.mrb[11].mxu0  ;;  %v2706_v4 = vadd.f32 %v2705_v55, %v2087_v53  ;;  %v2709_v5 = vadd.f32 %v1705_v62, %v4057_v7  ;;  %3235 = vtanh.f32 %v2704_v60 }
 0x233   : > { %v2708_v8 = vadd.f32 %v2707_v61, %v2089_v57  ;;  %2356 = vmatprep.subr.bf16.mxu1 %v2290_v0 }
 0x234   : > { %3237 = vtanh.f32 %v2706_v4  ;;  %v2710_v10 = vadd.f32 %v2709_v5, %v2091_v63  ;;  %2357 = vmatpush1.bf16.xpose.msra.mxu1 %v2289_v58  ;;  %v3228_v12 = vpop.eup %3227 }
 0x235   : > { %3239 = vtanh.f32 %v2708_v8  ;;  %v3230_v13 = vpop.eup %3229  ;;  %v1709_v14 = vpop.f32.mrb[12].mxu1 }
 0x236   : > { %3241 = vtanh.f32 %v2710_v10  ;;  %v2095_v15 = vpop.f32.mrb[12].mxu0  ;;  %v3232_v16 = vpop.eup %3231  ;;  %v2711_v17 = vadd.f32 %v1709_v14, %v4055_v6 }
 0x237   : > { %v1711_v18 = vpop.f32.mrb[13].mxu1  ;;  %v2097_v19 = vpop.f32.mrb[13].mxu0  ;;  %v2291_v24 = vpack.c.bf16 %v3232_v16, %v3228_v12 }
 0x238   : > { %v3234_v20 = vpop.eup %3233  ;;  %v2713_v21 = vadd.f32 %v1711_v18, %v4057_v7  ;;  %v1713_v22 = vpop.f32.mrb[14].mxu1  ;;  %v2712_v25 = vadd.f32 %v2711_v17, %v2095_v15 }
 0x239   : > { %v2099_v23 = vpop.f32.mrb[14].mxu0  ;;  %v2715_v26 = vadd.f32 %v1713_v22, %v4055_v6  ;;  %v1715_v27 = vpop.f32.mrb[15].mxu1  ;;  %v2292_v29 = vpack.c.bf16 %v3234_v20, %v3230_v13 }
 0x23a   : > { %v2101_v28 = vpop.f32.mrb[15].mxu0  ;;  %v2714_v30 = vadd.f32 %v2713_v21, %v2097_v19  ;;  %v2717_v31 = vadd.f32 %v1715_v27, %v4057_v7  ;;  %3243 = vtanh.f32 %v2712_v25 }
 0x23b   : > { %v2716_v32 = vadd.f32 %v2715_v26, %v2099_v23  ;;  %2358 = vmatprep.subr.bf16.mxu1 %v2292_v29 }
 0x23c   : > { %3245 = vtanh.f32 %v2714_v30  ;;  %v2718_v33 = vadd.f32 %v2717_v31, %v2101_v28  ;;  %2359 = vmatpush1.bf16.xpose.msra.mxu1 %v2291_v24  ;;  %v3236_v34 = vpop.eup %3235 }
 0x23d   : > { %3247 = vtanh.f32 %v2716_v32  ;;  %v1719_v36 = vpop.f32.mrb[16].mxu1 }
 0x23e   : > { %v3238_v35 = vpop.eup %3237  ;;  %3249 = vtanh.f32 %v2718_v33  ;;  %v2105_v37 = vpop.f32.mrb[16].mxu0  ;;  %v2719_v39 = vadd.f32 %v1719_v36, %v4055_v6 }
 0x23f   : > { %v3240_v38 = vpop.eup %3239  ;;  %v1721_v40 = vpop.f32.mrb[17].mxu1 }
 0x240   : > { %v2107_v41 = vpop.f32.mrb[17].mxu0  ;;  %v3242_v43 = vpop.eup %3241  ;;  %v2721_v44 = vadd.f32 %v1721_v40, %v4057_v7  ;;  %v2293_v47 = vpack.c.bf16 %v3240_v38, %v3236_v34  ;;  %v2720_v48 = vadd.f32 %v2719_v39, %v2105_v37 }
 0x241   : > { %v1723_v45 = vpop.f32.mrb[18].mxu1  ;;  %v2109_v46 = vpop.f32.mrb[18].mxu0  ;;  %v2294_v53 = vpack.c.bf16 %v3242_v43, %v3238_v35 }
 0x242   : > { %v2723_v50 = vadd.f32 %v1723_v45, %v4055_v6  ;;  %v1725_v51 = vpop.f32.mrb[19].mxu1  ;;  %v2111_v52 = vpop.f32.mrb[19].mxu0  ;;  %v2722_v54 = vadd.f32 %v2721_v44, %v2107_v41  ;;  %3251 = vtanh.f32 %v2720_v48 }
 0x243   : > { %v2725_v55 = vadd.f32 %v1725_v51, %v4057_v7  ;;  %2360 = vmatprep.subr.bf16.mxu1 %v2294_v53 }
 0x244   : > { %v2724_v56 = vadd.f32 %v2723_v50, %v2109_v46  ;;  %3253 = vtanh.f32 %v2722_v54  ;;  %2361 = vmatpush1.bf16.xpose.msra.mxu1 %v2293_v47  ;;  %v3244_v58 = vpop.eup %3243 }
 0x245   : > { %v2726_v57 = vadd.f32 %v2725_v55, %v2111_v52  ;;  %v1729_v60 = vpop.f32.mrb[20].mxu1 }
 0x246   : > { %3255 = vtanh.f32 %v2724_v56  ;;  %v3246_v59 = vpop.eup %3245  ;;  %v2115_v61 = vpop.f32.mrb[20].mxu0  ;;  %v2727_v63 = vadd.f32 %v1729_v60, %v4055_v6 }
 0x247   : > { %3257 = vtanh.f32 %v2726_v57  ;;  %v3248_v62 = vpop.eup %3247  ;;  %v1731_v0 = vpop.f32.mrb[21].mxu1 }
 0x248   : > { %v2117_v4 = vpop.f32.mrb[21].mxu0  ;;  %v3250_v5 = vpop.eup %3249  ;;  %v2729_v8 = vadd.f32 %v1731_v0, %v4057_v7  ;;  %v2295_v11 = vpack.c.bf16 %v3248_v62, %v3244_v58  ;;  %v2728_v12 = vadd.f32 %v2727_v63, %v2115_v61 }
 0x249   : > { %v1733_v9 = vpop.f32.mrb[22].mxu1  ;;  %v2119_v10 = vpop.f32.mrb[22].mxu0  ;;  %v2296_v16 = vpack.c.bf16 %v3250_v5, %v3246_v59 }
 0x24a   : > { %v2731_v13 = vadd.f32 %v1733_v9, %v4055_v6  ;;  %v1735_v14 = vpop.f32.mrb[23].mxu1  ;;  %v2121_v15 = vpop.f32.mrb[23].mxu0  ;;  %v2730_v17 = vadd.f32 %v2729_v8, %v2117_v4  ;;  %3259 = vtanh.f32 %v2728_v12 }
 0x24b   : > { %v2733_v18 = vadd.f32 %v1735_v14, %v4057_v7  ;;  %2362 = vmatprep.subr.bf16.mxu1 %v2296_v16 }
 0x24c   : > { %v2732_v19 = vadd.f32 %v2731_v13, %v2119_v10  ;;  %3261 = vtanh.f32 %v2730_v17  ;;  %2363 = vmatpush1.bf16.xpose.msra.mxu1 %v2295_v11  ;;  %v3252_v21 = vpop.eup %3251 }
 0x24d   : > { %v2734_v20 = vadd.f32 %v2733_v18, %v2121_v15  ;;  %v1739_v23 = vpop.f32.mrb[24].mxu1 }
 0x24e   : > { %3263 = vtanh.f32 %v2732_v19  ;;  %v3254_v22 = vpop.eup %3253  ;;  %v2125_v24 = vpop.f32.mrb[24].mxu0  ;;  %v2735_v26 = vadd.f32 %v1739_v23, %v4055_v6 }
 0x24f   : > { %3265 = vtanh.f32 %v2734_v20  ;;  %v1741_v27 = vpop.f32.mrb[25].mxu1  ;;  %v2127_v28 = vpop.f32.mrb[25].mxu0 }
 0x250   : > { %v3256_v25 = vpop.eup %3255  ;;  %v2737_v30 = vadd.f32 %v1741_v27, %v4057_v7  ;;  %v1743_v31 = vpop.f32.mrb[26].mxu1  ;;  %v2736_v34 = vadd.f32 %v2735_v26, %v2125_v24 }
 0x251   : > { %v3258_v29 = vpop.eup %3257  ;;  %v2129_v32 = vpop.f32.mrb[26].mxu0  ;;  %v2297_v33 = vpack.c.bf16 %v3256_v25, %v3252_v21  ;;  %v2739_v35 = vadd.f32 %v1743_v31, %v4055_v6 }
 0x252   : > { %v1745_v36 = vpop.f32.mrb[27].mxu1  ;;  %v2131_v37 = vpop.f32.mrb[27].mxu0  ;;  %v2298_v38 = vpack.c.bf16 %v3258_v29, %v3254_v22  ;;  %v2738_v39 = vadd.f32 %v2737_v30, %v2127_v28  ;;  %3267 = vtanh.f32 %v2736_v34 }
 0x253   : > { %v2741_v40 = vadd.f32 %v1745_v36, %v4057_v7  ;;  %v2740_v41 = vadd.f32 %v2739_v35, %v2129_v32 }
 0x254   : > { %2364 = vmatprep.subr.bf16.mxu1 %v2298_v38  ;;  %3269 = vtanh.f32 %v2738_v39  ;;  %v3260_v44 = vpop.eup %3259 }
 0x255   : > { %v2742_v43 = vadd.f32 %v2741_v40, %v2131_v37  ;;  %2365 = vmatpush1.bf16.xpose.msra.mxu1 %v2297_v33  ;;  %3271 = vtanh.f32 %v2740_v41  ;;  %v1749_v46 = vpop.f32.mrb[28].mxu1 }
 0x256   : > { %v3262_v45 = vpop.eup %3261  ;;  %v2135_v47 = vpop.f32.mrb[28].mxu0  ;;  %v2743_v50 = vadd.f32 %v1749_v46, %v4055_v6 }
 0x257   : > { %3273 = vtanh.f32 %v2742_v43  ;;  %v1751_v51 = vpop.f32.mrb[29].mxu1  ;;  %v2137_v52 = vpop.f32.mrb[29].mxu0 }
 0x258   : > { %v3264_v48 = vpop.eup %3263  ;;  %v2745_v54 = vadd.f32 %v1751_v51, %v4057_v7  ;;  %v1753_v55 = vpop.f32.mrb[30].mxu1  ;;  %v2744_v58 = vadd.f32 %v2743_v50, %v2135_v47 }
 0x259   : > { %v3266_v53 = vpop.eup %3265  ;;  %v2139_v56 = vpop.f32.mrb[30].mxu0  ;;  %v2299_v57 = vpack.c.bf16 %v3264_v48, %v3260_v44  ;;  %v2747_v59 = vadd.f32 %v1753_v55, %v4055_v6 }
 0x25a   : > { %v1755_v60 = vpop.f32.mrb[31].mxu1  ;;  %v2141_v61 = vpop.f32.mrb[31].mxu0  ;;  %v2300_v62 = vpack.c.bf16 %v3266_v53, %v3262_v45  ;;  %v2746_v63 = vadd.f32 %v2745_v54, %v2137_v52  ;;  %3275 = vtanh.f32 %v2744_v58 }
 0x25b   : > { %v2749_v0 = vadd.f32 %v1755_v60, %v4057_v7  ;;  %v2748_v4 = vadd.f32 %v2747_v59, %v2139_v56 }
 0x25c   : > { %2366 = vmatprep.subr.bf16.mxu1 %v2300_v62  ;;  %3277 = vtanh.f32 %v2746_v63  ;;  %v3268_v8 = vpop.eup %3267 }
 0x25d   : > { %v2750_v5 = vadd.f32 %v2749_v0, %v2141_v61  ;;  %2367 = vmatpush1.bf16.xpose.msra.mxu1 %v2299_v57  ;;  %3279 = vtanh.f32 %v2748_v4  ;;  %v1759_v10 = vpop.f32.mrb[32].mxu1 }
 0x25e   : > { %v3270_v9 = vpop.eup %3269  ;;  %v2145_v11 = vpop.f32.mrb[32].mxu0  ;;  %v2751_v13 = vadd.f32 %v1759_v10, %v4055_v6 }
 0x25f   : > { %3281 = vtanh.f32 %v2750_v5  ;;  %v3272_v12 = vpop.eup %3271  ;;  %v1761_v14 = vpop.f32.mrb[33].mxu1 }
 0x260   : > { %v2147_v15 = vpop.f32.mrb[33].mxu0  ;;  %v2753_v17 = vadd.f32 %v1761_v14, %v4057_v7  ;;  %v1763_v18 = vpop.f32.mrb[34].mxu1  ;;  %v2301_v20 = vpack.c.bf16 %v3272_v12, %v3268_v8  ;;  %v2752_v21 = vadd.f32 %v2751_v13, %v2145_v11 }
 0x261   : > { %v3274_v16 = vpop.eup %3273  ;;  %v2149_v19 = vpop.f32.mrb[34].mxu0  ;;  %v2755_v22 = vadd.f32 %v1763_v18, %v4055_v6 }
 0x262   : > { %v1765_v23 = vpop.f32.mrb[35].mxu1  ;;  %v2151_v24 = vpop.f32.mrb[35].mxu0  ;;  %v2302_v25 = vpack.c.bf16 %v3274_v16, %v3270_v9  ;;  %v2754_v26 = vadd.f32 %v2753_v17, %v2147_v15  ;;  %3283 = vtanh.f32 %v2752_v21 }
 0x263   : > { %v2757_v27 = vadd.f32 %v1765_v23, %v4057_v7  ;;  %v2756_v28 = vadd.f32 %v2755_v22, %v2149_v19 }
 0x264   : > { %2368 = vmatprep.subr.bf16.mxu1 %v2302_v25  ;;  %3285 = vtanh.f32 %v2754_v26  ;;  %v3276_v30 = vpop.eup %3275 }
 0x265   : > { %v2758_v29 = vadd.f32 %v2757_v27, %v2151_v24  ;;  %2369 = vmatpush1.bf16.xpose.msra.mxu1 %v2301_v20  ;;  %3287 = vtanh.f32 %v2756_v28  ;;  %v1769_v32 = vpop.f32.mrb[36].mxu1 }
 0x266   : > { %v3278_v31 = vpop.eup %3277  ;;  %v2155_v33 = vpop.f32.mrb[36].mxu0  ;;  %v2759_v35 = vadd.f32 %v1769_v32, %v4055_v6 }
 0x267   : > { %3289 = vtanh.f32 %v2758_v29  ;;  %v3280_v34 = vpop.eup %3279  ;;  %v1771_v36 = vpop.f32.mrb[37].mxu1 }
 0x268   : > { %v2157_v37 = vpop.f32.mrb[37].mxu0  ;;  %v2761_v39 = vadd.f32 %v1771_v36, %v4057_v7  ;;  %v1773_v40 = vpop.f32.mrb[38].mxu1  ;;  %v2303_v43 = vpack.c.bf16 %v3280_v34, %v3276_v30  ;;  %v2760_v44 = vadd.f32 %v2759_v35, %v2155_v33 }
 0x269   : > { %v3282_v38 = vpop.eup %3281  ;;  %v2159_v41 = vpop.f32.mrb[38].mxu0  ;;  %v2763_v45 = vadd.f32 %v1773_v40, %v4055_v6 }
 0x26a   : > { %v1775_v46 = vpop.f32.mrb[39].mxu1  ;;  %v2161_v47 = vpop.f32.mrb[39].mxu0  ;;  %v2304_v48 = vpack.c.bf16 %v3282_v38, %v3278_v31  ;;  %v2762_v50 = vadd.f32 %v2761_v39, %v2157_v37  ;;  %3291 = vtanh.f32 %v2760_v44 }
 0x26b   : > { %v2765_v51 = vadd.f32 %v1775_v46, %v4057_v7  ;;  %v2764_v52 = vadd.f32 %v2763_v45, %v2159_v41 }
 0x26c   : > { %2370 = vmatprep.subr.bf16.mxu1 %v2304_v48  ;;  %3293 = vtanh.f32 %v2762_v50  ;;  %v3284_v54 = vpop.eup %3283 }
 0x26d   : > { %v2766_v53 = vadd.f32 %v2765_v51, %v2161_v47  ;;  %2371 = vmatpush1.bf16.xpose.msra.mxu1 %v2303_v43  ;;  %3295 = vtanh.f32 %v2764_v52  ;;  %v1779_v56 = vpop.f32.mrb[40].mxu1 }
 0x26e   : > { %v3286_v55 = vpop.eup %3285  ;;  %v2165_v57 = vpop.f32.mrb[40].mxu0  ;;  %v2767_v59 = vadd.f32 %v1779_v56, %v4055_v6 }
 0x26f   : > { %3297 = vtanh.f32 %v2766_v53  ;;  %v3288_v58 = vpop.eup %3287  ;;  %v1781_v60 = vpop.f32.mrb[41].mxu1 }
 0x270   : > { %v2167_v61 = vpop.f32.mrb[41].mxu0  ;;  %v2769_v63 = vadd.f32 %v1781_v60, %v4057_v7  ;;  %v1783_v0 = vpop.f32.mrb[42].mxu1  ;;  %v2305_v5 = vpack.c.bf16 %v3288_v58, %v3284_v54  ;;  %v2768_v8 = vadd.f32 %v2767_v59, %v2165_v57 }
 0x271   : > { %v3290_v62 = vpop.eup %3289  ;;  %v2169_v4 = vpop.f32.mrb[42].mxu0  ;;  %v2771_v9 = vadd.f32 %v1783_v0, %v4055_v6 }
 0x272   : > { %v1785_v10 = vpop.f32.mrb[43].mxu1  ;;  %v2171_v11 = vpop.f32.mrb[43].mxu0  ;;  %v2306_v12 = vpack.c.bf16 %v3290_v62, %v3286_v55  ;;  %v2770_v13 = vadd.f32 %v2769_v63, %v2167_v61  ;;  %3299 = vtanh.f32 %v2768_v8 }
 0x273   : > { %v2773_v14 = vadd.f32 %v1785_v10, %v4057_v7  ;;  %v2772_v15 = vadd.f32 %v2771_v9, %v2169_v4 }
 0x274   : > { %2372 = vmatprep.subr.bf16.mxu1 %v2306_v12  ;;  %3301 = vtanh.f32 %v2770_v13  ;;  %v3292_v17 = vpop.eup %3291 }
 0x275   : > { %v2774_v16 = vadd.f32 %v2773_v14, %v2171_v11  ;;  %2373 = vmatpush1.bf16.xpose.msra.mxu1 %v2305_v5  ;;  %3303 = vtanh.f32 %v2772_v15  ;;  %v1789_v19 = vpop.f32.mrb[44].mxu1 }
 0x276   : > { %v3294_v18 = vpop.eup %3293  ;;  %v2175_v20 = vpop.f32.mrb[44].mxu0  ;;  %v2775_v22 = vadd.f32 %v1789_v19, %v4055_v6 }
 0x277   : > { %3305 = vtanh.f32 %v2774_v16  ;;  %v3296_v21 = vpop.eup %3295  ;;  %v1791_v23 = vpop.f32.mrb[45].mxu1 }
 0x278   : > { %v2177_v24 = vpop.f32.mrb[45].mxu0  ;;  %v2777_v26 = vadd.f32 %v1791_v23, %v4057_v7  ;;  %v1793_v27 = vpop.f32.mrb[46].mxu1  ;;  %v2307_v29 = vpack.c.bf16 %v3296_v21, %v3292_v17  ;;  %v2776_v30 = vadd.f32 %v2775_v22, %v2175_v20 }
 0x279   : > { %v3298_v25 = vpop.eup %3297  ;;  %v2179_v28 = vpop.f32.mrb[46].mxu0  ;;  %v2779_v31 = vadd.f32 %v1793_v27, %v4055_v6 }
 0x27a   : > { %v1795_v32 = vpop.f32.mrb[47].mxu1  ;;  %v2181_v33 = vpop.f32.mrb[47].mxu0  ;;  %v2308_v34 = vpack.c.bf16 %v3298_v25, %v3294_v18  ;;  %v2778_v35 = vadd.f32 %v2777_v26, %v2177_v24  ;;  %3307 = vtanh.f32 %v2776_v30 }
 0x27b   : > { %v2781_v36 = vadd.f32 %v1795_v32, %v4057_v7  ;;  %v2780_v37 = vadd.f32 %v2779_v31, %v2179_v28 }
 0x27c   : > { %2374 = vmatprep.subr.bf16.mxu1 %v2308_v34  ;;  %3309 = vtanh.f32 %v2778_v35  ;;  %v3300_v39 = vpop.eup %3299 }
 0x27d   : > { %v2782_v38 = vadd.f32 %v2781_v36, %v2181_v33  ;;  %2375 = vmatpush1.bf16.xpose.msra.mxu1 %v2307_v29  ;;  %3311 = vtanh.f32 %v2780_v37  ;;  %v1799_v41 = vpop.f32.mrb[48].mxu1 }
 0x27e   : > { %v3302_v40 = vpop.eup %3301  ;;  %v2185_v43 = vpop.f32.mrb[48].mxu0  ;;  %v2783_v45 = vadd.f32 %v1799_v41, %v4055_v6 }
 0x27f   : > { %3313 = vtanh.f32 %v2782_v38  ;;  %v3304_v44 = vpop.eup %3303  ;;  %v1801_v46 = vpop.f32.mrb[49].mxu1 }
 0x280   : > { %v2187_v47 = vpop.f32.mrb[49].mxu0  ;;  %v2785_v50 = vadd.f32 %v1801_v46, %v4057_v7  ;;  %v1803_v51 = vpop.f32.mrb[50].mxu1  ;;  %v2309_v53 = vpack.c.bf16 %v3304_v44, %v3300_v39  ;;  %v2784_v54 = vadd.f32 %v2783_v45, %v2185_v43 }
 0x281   : > { %v3306_v48 = vpop.eup %3305  ;;  %v2189_v52 = vpop.f32.mrb[50].mxu0  ;;  %v2787_v55 = vadd.f32 %v1803_v51, %v4055_v6 }
 0x282   : > { %v1805_v56 = vpop.f32.mrb[51].mxu1  ;;  %v2191_v57 = vpop.f32.mrb[51].mxu0  ;;  %v2310_v58 = vpack.c.bf16 %v3306_v48, %v3302_v40  ;;  %v2786_v59 = vadd.f32 %v2785_v50, %v2187_v47  ;;  %3315 = vtanh.f32 %v2784_v54 }
 0x283   : > { %v2789_v60 = vadd.f32 %v1805_v56, %v4057_v7  ;;  %v2788_v61 = vadd.f32 %v2787_v55, %v2189_v52 }
 0x284   : > { %2376 = vmatprep.subr.bf16.mxu1 %v2310_v58  ;;  %3317 = vtanh.f32 %v2786_v59  ;;  %v3308_v63 = vpop.eup %3307 }
 0x285   : > { %v2790_v62 = vadd.f32 %v2789_v60, %v2191_v57  ;;  %2377 = vmatpush1.bf16.xpose.msra.mxu1 %v2309_v53  ;;  %3319 = vtanh.f32 %v2788_v61  ;;  %v1809_v4 = vpop.f32.mrb[52].mxu1 }
 0x286   : > { %v3310_v0 = vpop.eup %3309  ;;  %v2195_v5 = vpop.f32.mrb[52].mxu0  ;;  %v2791_v9 = vadd.f32 %v1809_v4, %v4055_v6 }
 0x287   : > { %3321 = vtanh.f32 %v2790_v62  ;;  %v3312_v8 = vpop.eup %3311  ;;  %v1811_v10 = vpop.f32.mrb[53].mxu1 }
 0x288   : > { %v2197_v11 = vpop.f32.mrb[53].mxu0  ;;  %v2793_v13 = vadd.f32 %v1811_v10, %v4057_v7  ;;  %v1813_v14 = vpop.f32.mrb[54].mxu1  ;;  %v2311_v16 = vpack.c.bf16 %v3312_v8, %v3308_v63  ;;  %v2792_v17 = vadd.f32 %v2791_v9, %v2195_v5 }
 0x289   : > { %v3314_v12 = vpop.eup %3313  ;;  %v2199_v15 = vpop.f32.mrb[54].mxu0  ;;  %v2795_v18 = vadd.f32 %v1813_v14, %v4055_v6 }
 0x28a   : > { %v1815_v19 = vpop.f32.mrb[55].mxu1  ;;  %v2201_v20 = vpop.f32.mrb[55].mxu0  ;;  %v2312_v21 = vpack.c.bf16 %v3314_v12, %v3310_v0  ;;  %v2794_v22 = vadd.f32 %v2793_v13, %v2197_v11  ;;  %3323 = vtanh.f32 %v2792_v17 }
 0x28b   : > { %v2797_v23 = vadd.f32 %v1815_v19, %v4057_v7  ;;  %v2796_v24 = vadd.f32 %v2795_v18, %v2199_v15 }
 0x28c   : > { %2378 = vmatprep.subr.bf16.mxu1 %v2312_v21  ;;  %3325 = vtanh.f32 %v2794_v22  ;;  %v3316_v26 = vpop.eup %3315 }
 0x28d   : > { %v2798_v25 = vadd.f32 %v2797_v23, %v2201_v20  ;;  %2379 = vmatpush1.bf16.xpose.msra.mxu1 %v2311_v16  ;;  %3327 = vtanh.f32 %v2796_v24  ;;  %v1819_v28 = vpop.f32.mrb[56].mxu1  ;;  %v2346_v23 = vrot.slane %v4067_v42, %v4072_v49 }
 0x28e   : > { %v3318_v27 = vpop.eup %3317  ;;  %v2205_v29 = vpop.f32.mrb[56].mxu0  ;;  %v2799_v31 = vadd.f32 %v1819_v28, %v4055_v6 }
 0x28f   : > { %3329 = vtanh.f32 %v2798_v25  ;;  %v3320_v30 = vpop.eup %3319  ;;  %v1821_v32 = vpop.f32.mrb[57].mxu1 }
 0x290   : > { %v2207_v33 = vpop.f32.mrb[57].mxu0  ;;  %v2801_v35 = vadd.f32 %v1821_v32, %v4057_v7  ;;  %v1823_v36 = vpop.f32.mrb[58].mxu1  ;;  %v2313_v38 = vpack.c.bf16 %v3320_v30, %v3316_v26  ;;  %v2800_v39 = vadd.f32 %v2799_v31, %v2205_v29 }
 0x291   : > { %v3322_v34 = vpop.eup %3321  ;;  %v2209_v37 = vpop.f32.mrb[58].mxu0  ;;  %v2803_v40 = vadd.f32 %v1823_v36, %v4055_v6 }
 0x292   : > { %v1825_v41 = vpop.f32.mrb[59].mxu1  ;;  %v2211_v43 = vpop.f32.mrb[59].mxu0  ;;  %v2314_v44 = vpack.c.bf16 %v3322_v34, %v3318_v27  ;;  %v2802_v45 = vadd.f32 %v2801_v35, %v2207_v33  ;;  %3331 = vtanh.f32 %v2800_v39 }
 0x293   : > { %v2805_v46 = vadd.f32 %v1825_v41, %v4057_v7  ;;  %v2804_v47 = vadd.f32 %v2803_v40, %v2209_v37 }
 0x294   : > { %2380 = vmatprep.subr.bf16.mxu1 %v2314_v44  ;;  %3333 = vtanh.f32 %v2802_v45  ;;  %v3324_v50 = vpop.eup %3323 }
 0x295   : > { %v2806_v48 = vadd.f32 %v2805_v46, %v2211_v43  ;;  %2381 = vmatpush1.bf16.xpose.msra.mxu1 %v2313_v38  ;;  %3335 = vtanh.f32 %v2804_v47  ;;  %v1829_v52 = vpop.f32.mrb[60].mxu1 }
 0x296   : > { %v3326_v51 = vpop.eup %3325  ;;  %v2215_v53 = vpop.f32.mrb[60].mxu0  ;;  %v2807_v55 = vadd.f32 %v1829_v52, %v4055_v6 }
 0x297   : > { %3337 = vtanh.f32 %v2806_v48  ;;  %v3328_v54 = vpop.eup %3327  ;;  %v1831_v56 = vpop.f32.mrb[61].mxu1 }
 0x298   : > { %v2217_v57 = vpop.f32.mrb[61].mxu0  ;;  %v2809_v59 = vadd.f32 %v1831_v56, %v4057_v7  ;;  %v1833_v60 = vpop.f32.mrb[62].mxu1  ;;  %v2315_v62 = vpack.c.bf16 %v3328_v54, %v3324_v50  ;;  %v2808_v63 = vadd.f32 %v2807_v55, %v2215_v53 }
 0x299   : > { %v3330_v58 = vpop.eup %3329  ;;  %v2219_v61 = vpop.f32.mrb[62].mxu0  ;;  %v2811_v0 = vadd.f32 %v1833_v60, %v4055_v6 }
 0x29a   : > { %v1835_v4 = vpop.f32.mrb[63].mxu1  ;;  %v2221_v5 = vpop.f32.mrb[63].mxu0  ;;  %v2316_v8 = vpack.c.bf16 %v3330_v58, %v3326_v51  ;;  %v2810_v9 = vadd.f32 %v2809_v59, %v2217_v57  ;;  %3339 = vtanh.f32 %v2808_v63 }
 0x29b   : > { %v2813_v10 = vadd.f32 %v1835_v4, %v4057_v7  ;;  %v2812_v11 = vadd.f32 %v2811_v0, %v2219_v61 }
 0x29c   : > { %2382 = vmatprep.subr.bf16.mxu1 %v2316_v8  ;;  %3341 = vtanh.f32 %v2810_v9  ;;  %v3332_v13 = vpop.eup %3331 }
 0x29d   : > { %v2814_v12 = vadd.f32 %v2813_v10, %v2221_v5  ;;  %2383 = vmatpush1.bf16.xpose.msra.mxu1 %v2315_v62  ;;  %3343 = vtanh.f32 %v2812_v11 }
 0x29e   : > { %v3334_v14 = vpop.eup %3333 }
 0x29f   : > { %3345 = vtanh.f32 %v2814_v12  ;;  %v3336_v15 = vpop.eup %3335 }
 0x2a0   : > { %v2317_v17 = vpack.c.bf16 %v3336_v15, %v3332_v13  ;;  %v2325_v24 = vpop.permute.xlu0 %2324 }
 0x2a1   : > { %v3338_v16 = vpop.eup %3337  ;;  %v2330_v25 = vrot.slane %v2325_v24, %v804_v3 }
 0x2a2   : > { %v2318_v6 = vpack.c.bf16 %v3338_v16, %v3334_v14 }
 0x2a4   : > { %2384 = vmatprep.subr.bf16.mxu1 %v2318_v6  ;;  %v3340_v18 = vpop.eup %3339 }
 0x2a5   : > { %2385 = vmatpush1.bf16.xpose.msra.mxu1 %v2317_v17 }
 0x2a6   : > { %v3342_v19 = vpop.eup %3341 }
 0x2a7   : > { %v3344_v7 = vpop.eup %3343 }
 0x2a8   : > { %v2319_v21 = vpack.c.bf16 %v3344_v7, %v3340_v18 }
 0x2a9   : > { %v3346_v20 = vpop.eup %3345 }
 0x2aa   : > { %v2320_v22 = vpack.c.bf16 %v3346_v20, %v3342_v19 }
 0x2ac   : > { %2386 = vmatprep.subr.bf16.mxu1 %v2320_v22 }
 0x2ad   : > { %2387 = vmatpush1.bf16.xpose.msra.mxu1 %v2319_v21 }
 0x2b4   : > { %2389 = vmatmul.mubr.bf16.vlgmr.msra.gmra.mrb[64].mxu1 %v2346_v23 }
 0x387   : > { %v2390_v26 = vpop.f32.mrb[64].mxu1 }
 0x388   : > { %v2391_v27 = vadd.f32 %v2390_v26, %v2330_v25  ;;  %v2392_v28 = vpop.f32.mrb[65].mxu1 }
 0x389   : > { %v2393_v29 = vadd.f32 %v2392_v28, %v2330_v25  ;;  %v2394_v30 = vpop.f32.mrb[66].mxu1 }
 0x38a   : > { %v2395_v31 = vpop.f32.mrb[67].mxu1 }
 0x38b   : > { %v2399_v32 = vcombine.low %v2391_v27, %v2393_v29 }
 0x38d   : > { %v2406_v42 = vrot.slane %v2399_v32, %v4072_v49 }
 0x38f   : > { %v2413_v2 = vrot.slane %v2406_v42, %v4072_v49 }
 0x391   : > { %2419 = vst.msk [vmem:[%s285_s28] sm:$0x3] %vm2417_vm0, %v2413_v2 }
 0x392   : > { %3474 = shalt.err (!%p3471_p4)
}
 0x393   : > { %s3475_s6 = scalar_lea.hbm %s4143_s18, 32  ;;  %s3479_s13 = scalar_lea.hbm %s4192_s5, 64 }
 0x394   : > { %p3476_p9 = scmp.ne.s32.totalorder %s4143_s18, %s3475_s6  ;;  %p3480_p8 = scmp.lt.u32.totalorder %s4143_s18, %s4192_s5 }
 0x395   : > { %p3481_p13 = scmp.lt.u32.totalorder %s3479_s13, %s3475_s6  ;;  %p3483_p10 = scmp.lt.u32.totalorder %s3475_s6, %s4143_s18 }
 0x396   : > { %p3477_p0 = pnand %p3476_p9, %p3726_p5 }
 0x397   : > { %p3482_p6 = por %p3481_p13, %p3480_p8 }
 0x398   : > { %p3478_p11 = pneg %p3477_p0 }
 0x399   : > { %p3484_p3 = por %p3483_p10, %p3482_p6 }
 0x39b   : > { %p3485_p7 = pnand %p3484_p3, %p3478_p11 }
 0x39d   : > { %3488 = shalt.err (!%p3485_p7)
}
 0x39e   : > { %2957 = dma.vmem_to_hbm [thread:$0]  (%p3726_p5), %s4145_s8, 32, %s4143_s18, %s2421_s4  }
 0x39f PF: > { %s2447_s25 = sand.u32 1, %s3523_s20   ;;  %p4210_p12 = scmp.ne.s32.totalorder %s4197_s26, 0 }
 0x3a0   : > { %p4211_p2 = scmp.ge.s32.totalorder %s3535_s23, 2  ;;  %s2448_s27 = scalar_lea.sflag [#allocation5], %s2447_s25 }
 0x3a2   : > { %p2974_p1 = pnand %p4211_p2, %p4210_p12 }
 0x3a4   : > { %3518 = dma.done.wait (!%p2974_p1), %s2448_s27, 32  }
 0x3a5   : > { %3520 = vsyncadd (!%p2974_p1), %s2448_s27, 4294967264  ;;  %p22_p4 = scmp.ge.s32.totalorder %s3712_s15, 4   ;;  %s4212_s20 = smov %s3527_s21 }
 0x3a6   : > { %s4213_s21 = smov %s3531_s22  ;;  %s4214_s22 = smov %s3722_s16 }
 0x3a7   : > { %s4215_s23 = smov %s3712_s15  ;;  %24 = sbr.rel (!%p22_p4) target bundleno = 10 (0xa), region = 97 }
 0x3ae   :  { %2453 = vsyncpa [#allocation4], 1 }
 0x3af   :  { %2455 = vsyncpa [#allocation4 + $0x1], 1 }
 0x3b0   :  { %2456 = vsyncpa [#allocation7], 1 }
 0x3b1   :  { %2457 = vsyncpa [#allocation10], 1 }
 0x3b2   :  { %2458 = vsyncpa [#allocation5], 1 }
 0x3b3   :  { %2460 = vsyncpa [#allocation5 + $0x1], 1 }

</bundles_post_ra>
